<compile_context>
chip_gen: v7x
topology: tpu7x:2x2x1
jax: 0.10.0
libtpu: 0.0.40
codegen_flags: <defaults>
</compile_context>

<pallas_src>
import functools

import jax
import jax.numpy as jnp
from jax import lax
from jax.experimental import pallas as pl
from jax.experimental.pallas import tpu as pltpu


# ----------------------------------------------------------------------------
# Elementwise helpers used inside the kernel
# ----------------------------------------------------------------------------
def _erf_approx(x):
    # Abramowitz & Stegun 7.1.26 (max abs error ~1.5e-7), built from
    # exp/abs/where only so it lowers cleanly in Mosaic.  exp rides the EUP.
    a1 = 0.254829592
    a2 = -0.284496736
    a3 = 1.421413741
    a4 = -1.453152027
    a5 = 1.061405429
    p = 0.3275911
    sign = jnp.where(x >= 0, 1.0, -1.0).astype(x.dtype)
    ax = jnp.abs(x)
    t = 1.0 / (1.0 + p * ax)
    poly = ((((a5 * t + a4) * t + a3) * t + a2) * t + a1) * t
    return sign * (1.0 - poly * jnp.exp(-ax * ax))


def _gelu_exact(x):
    # F.gelu default (approximate='none'):  0.5 * x * (1 + erf(x / sqrt(2)))
    return 0.5 * x * (1.0 + _erf_approx(x * 0.7071067811865475))


# ----------------------------------------------------------------------------
# Fused encoder kernel: Nb batch elements per grid step, [C, Nb*L] layout.
# ----------------------------------------------------------------------------
def _fused_encoder_kernel(x_ref, w0_ref, b0_ref, w1_ref, b1_ref,
                          w2_ref, b2_ref, sel_ref, w3_ref, b3_ref,
                          g_ref, beta_ref, o_ref, *,
                          Nb, K0, K1, L0, L1, L2):
    f32 = jnp.float32

    # ---- layer0: Conv1d(k=K0, s=1, p=0) + GELU as ONE im2col MXU matmul ------
    # im2col rows are tap-major (k*Cin + cin); columns are batch-major lane
    # blocks of width L0, so the whole Nb-slab shares a single deep matmul.
    cols0 = []
    for nb in range(Nb):
        xb = x_ref[nb].astype(f32)                                    # [Cin, L]
        cols0.append(jnp.concatenate([xb[:, k:k + L0] for k in range(K0)],
                                     axis=0))                         # [K0*Cin, L0]
    im0 = jnp.concatenate(cols0, axis=1)                              # [K0*Cin, Nb*L0]
    h0 = _gelu_exact(jnp.dot(w0_ref[...].astype(f32), im0,
                             preferred_element_type=f32)
                     + b0_ref[...].astype(f32))                       # [H, Nb*L0]

    # ---- layer1: Conv1d(k=K1, s=1, p=0) + GELU --------------------------------
    rows1 = []
    for k in range(K1):
        rows1.append(jnp.concatenate(
            [h0[:, nb * L0 + k: nb * L0 + k + L1] for nb in range(Nb)],
            axis=1))                                                  # [H, Nb*L1]
    im1 = jnp.concatenate(rows1, axis=0)                              # [K1*H, Nb*L1]
    h1 = _gelu_exact(jnp.dot(w1_ref[...].astype(f32), im1,
                             preferred_element_type=f32)
                     + b1_ref[...].astype(f32))                       # [H, Nb*L1]

    # ---- layer2: Conv1d(k=4, s=2, p=1) + GELU ---------------------------------
    # One parity-deinterleave matmul per batch slab against the host-built 0/1
    # matrix [SelE | SelO]; the 4 taps then become contiguous +-1 column slices
    # (zero padding handled implicitly by out-of-range columns of Sel).
    L2p1 = L2 + 1
    sel = sel_ref[...].astype(f32)                                    # [L1, 2*(L2+1)]
    parts2 = []
    for nb in range(Nb):
        h1b = h1[:, nb * L1:(nb + 1) * L1]                            # [H, L1]
        eo = jnp.dot(h1b, sel, preferred_element_type=f32)            # [H, 2*(L2+1)]
        e, o = eo[:, :L2p1], eo[:, L2p1:]
        parts2.append(jnp.concatenate(
            [o[:, 0:L2],        # tap k=0: h1[:, 2j-1]
             e[:, 0:L2],        # tap k=1: h1[:, 2j  ]
             o[:, 1:L2p1],      # tap k=2: h1[:, 2j+1]
             e[:, 1:L2p1]],     # tap k=3: h1[:, 2j+2]
            axis=0))                                                  # [4*H, L2]
    im2 = jnp.concatenate(parts2, axis=1)                             # [4*H, Nb*L2]
    h2 = _gelu_exact(jnp.dot(w2_ref[...].astype(f32), im2,
                             preferred_element_type=f32)
                     + b2_ref[...].astype(f32))                       # [Dout, Nb*L2]

    # ---- layer3: Linear + GELU + LayerNorm over the channel axis --------------
    # In [D, L] layout the PyTorch NDL->NLD / NLD->NDL transposes cancel out.
    u = jnp.dot(w3_ref[...].astype(f32), h2, preferred_element_type=f32)
    u = _gelu_exact(u + b3_ref[...].astype(f32))                      # [Dout, Nb*L2]
    mu = jnp.mean(u, axis=0, keepdims=True)
    d = u - mu
    var = jnp.mean(d * d, axis=0, keepdims=True)
    inv = lax.rsqrt(var + 1e-5)                                       # torch eps
    y = d * inv * g_ref[...].astype(f32) + beta_ref[...].astype(f32)
    o_ref[0] = y.astype(o_ref.dtype)


# ----------------------------------------------------------------------------
# Wrapper
# ----------------------------------------------------------------------------
def _pick_nb(n, l2, target_lanes=1024):
    """Largest divisor of n whose packed lane width Nb*L2 stays ~target_lanes."""
    cap = max(1, target_lanes // max(l2, 1))
    nb = 1
    for d in range(1, n + 1):
        if n % d == 0 and d <= cap:
            nb = d
    return nb


def audio_encoder_conv1d(x, params):
    """x: [N, in_dim, L]  ->  [N, out_dim, L_out]  (matches the PyTorch forward)."""
    N, Cin, L = x.shape
    w0, b0 = params["w0"], params["b0"]
    w1, b1 = params["w1"], params["b1"]
    w2, b2 = params["w2"], params["b2"]
    w3, b3 = params["w3"], params["b3"]
    gamma, beta = params["gamma"], params["beta"]

    H, _, K0 = w0.shape
    _, _, K1 = w1.shape
    Dout, _, K2 = w2.shape
    stride2, pad2 = 2, 1

    L0 = L - (K0 - 1)                          # Conv1d(in, hid, 7, 1, 0)
    L1 = L0 - (K1 - 1)                         # Conv1d(hid, hid, 5, 1, 0)
    L2 = (L1 + 2 * pad2 - K2) // stride2 + 1   # Conv1d(hid, out, 4, 2, 1)

    Nb = _pick_nb(N, L2)                       # batch elements packed per grid step
    G = N // Nb

    f32 = jnp.float32
    # Flattened (im2col) conv weights: [Cout, K*Cin] with tap-major columns.
    w0_flat = jnp.transpose(w0, (0, 2, 1)).reshape(H, K0 * Cin).astype(f32)
    w1_flat = jnp.transpose(w1, (0, 2, 1)).reshape(H, K1 * H).astype(f32)
    w2_flat = jnp.transpose(w2, (0, 2, 1)).reshape(Dout, K2 * H).astype(f32)

    # Host-built parity-deinterleave matrix for the stride-2/pad-1 conv:
    #   [SelE | SelO],  SelE[i, m] = 1 iff i == 2m,  SelO[i, m] = 1 iff i == 2m-1.
    i_idx = jnp.arange(L1, dtype=jnp.int32)[:, None]
    m_idx = jnp.arange(L2 + 1, dtype=jnp.int32)[None, :]
    sel_eo = jnp.concatenate([(i_idx == 2 * m_idx).astype(f32),
                              (i_idx == 2 * m_idx - 1).astype(f32)], axis=1)

    kernel = functools.partial(_fused_encoder_kernel,
                               Nb=Nb, K0=K0, K1=K1, L0=L0, L1=L1, L2=L2)

    flops = 2 * N * (H * K0 * Cin * L0
                     + H * K1 * H * L1
                     + H * L1 * 2 * (L2 + 1)          # parity gather
                     + Dout * K2 * H * L2
                     + Dout * Dout * L2)
    transcendentals = N * (H * L0 + H * L1 + 2 * Dout * L2)   # one exp per GELU elem
    const_bytes = 4 * int(w0_flat.size + w1_flat.size + w2_flat.size + sel_eo.size
                          + w3.size + b0.size + b1.size + b2.size + b3.size
                          + gamma.size + beta.size)
    bytes_accessed = 4 * (int(x.size) + N * Dout * L2) + const_bytes

    # Rough per-step f32 VMEM footprint (I/O blocks + resident weights + largest
    # transients), with headroom; clamped to the 32 MiB scoped default so it is
    # safe on all generations at these shapes.
    act_bytes = 4 * Nb * (Cin * L + K0 * Cin * L0 + 2 * H * L0 + K1 * H * L1
                          + 2 * H * L1 + K2 * H * L2 + 4 * Dout * L2)
    vmem_limit = int(min(32 * 2 ** 20, max(8 * 2 ** 20, 4 * (act_bytes + const_bytes))))

    const2 = lambda g: (0, 0)

    out = pl.pallas_call(
        kernel,
        out_shape=jax.ShapeDtypeStruct((G, Dout, Nb * L2), x.dtype),
        grid=(G,),
        in_specs=[
            pl.BlockSpec((Nb, Cin, L), lambda g: (g, 0, 0)),   # x slab
            pl.BlockSpec((H, K0 * Cin), const2),               # w0 (im2col)
            pl.BlockSpec((H, 1), const2),                      # b0
            pl.BlockSpec((H, K1 * H), const2),                 # w1 (im2col)
            pl.BlockSpec((H, 1), const2),                      # b1
            pl.BlockSpec((Dout, K2 * H), const2),              # w2 (im2col)
            pl.BlockSpec((Dout, 1), const2),                   # b2
            pl.BlockSpec((L1, 2 * (L2 + 1)), const2),          # parity gather matrix
            pl.BlockSpec((Dout, Dout), const2),                # w3
            pl.BlockSpec((Dout, 1), const2),                   # b3
            pl.BlockSpec((Dout, 1), const2),                   # gamma
            pl.BlockSpec((Dout, 1), const2),                   # beta
        ],
        out_specs=pl.BlockSpec((1, Dout, Nb * L2), lambda g: (g, 0, 0)),
        compiler_params=pltpu.CompilerParams(
            dimension_semantics=("parallel",),     # shard batch groups across TCs
            vmem_limit_bytes=vmem_limit,
        ),
        cost_estimate=pl.CostEstimate(flops=flops,
                                      transcendentals=transcendentals,
                                      bytes_accessed=bytes_accessed),
    )(x, w0_flat, b0.reshape(H, 1).astype(f32),
      w1_flat, b1.reshape(H, 1).astype(f32),
      w2_flat, b2.reshape(Dout, 1).astype(f32),
      sel_eo, w3.astype(f32), b3.reshape(Dout, 1).astype(f32),
      gamma.reshape(Dout, 1).astype(f32), beta.reshape(Dout, 1).astype(f32))

    # Un-pack the lane-concatenated batch slabs back to NCL (layout plumbing only).
    out = out.reshape(G, Dout, Nb, L2)
    out = jnp.transpose(out, (0, 2, 1, 3)).reshape(N, Dout, L2)
    return out


# ----------------------------------------------------------------------------
# Pure-JAX reference (mirrors the PyTorch forward) for self-checking
# ----------------------------------------------------------------------------
def _reference_forward(x, params):
    hp = jax.lax.Precision.HIGHEST

    def conv1d(h, w, b, stride, pad):
        n, cin, lin = h.shape
        cout, _, kw = w.shape
        hpad = jnp.pad(h, ((0, 0), (0, 0), (pad, pad)))
        lout = (lin + 2 * pad - kw) // stride + 1
        idx = jnp.arange(lout)[:, None] * stride + jnp.arange(kw)[None, :]
        patches = hpad[:, :, idx]                               # [N, Cin, Lout, Kw]
        y = jnp.einsum("nclk,ock->nol", patches, w, precision=hp)
        return y + b[None, :, None]

    g = lambda v: jax.nn.gelu(v, approximate=False)
    h = g(conv1d(x, params["w0"], params["b0"], 1, 0))
    h = g(conv1d(h, params["w1"], params["b1"], 1, 0))
    h = g(conv1d(h, params["w2"], params["b2"], 2, 1))
    h = jnp.einsum("NDL->NLD", h)
    h = g(jnp.einsum("nld,ed->nle", h, params["w3"], precision=hp) + params["b3"])
    mu = jnp.mean(h, axis=-1, keepdims=True)
    var = jnp.mean((h - mu) ** 2, axis=-1, keepdims=True)
    h = (h - mu) * jax.lax.rsqrt(var + 1e-5) * params["gamma"] + params["beta"]
    return jnp.einsum("NLD->NDL", h)


# ----------------------------------------------------------------------------
# Deterministic parameter init + smoke test
# ----------------------------------------------------------------------------
def init_params(key, in_dim, hidden_dim, out_dim, dtype=jnp.float32):
    ks = jax.random.split(key, 8)
    scale = 0.1
    return {
        "w0": jax.random.normal(ks[0], (hidden_dim, in_dim, 7), dtype) * scale,
        "b0": jax.random.normal(ks[1], (hidden_dim,), dtype) * scale,
        "w1": jax.random.normal(ks[2], (hidden_dim, hidden_dim, 5), dtype) * scale,
        "b1": jax.random.normal(ks[3], (hidden_dim,), dtype) * scale,
        "w2": jax.random.normal(ks[4], (out_dim, hidden_dim, 4), dtype) * scale,
        "b2": jax.random.normal(ks[5], (out_dim,), dtype) * scale,
        "w3": jax.random.normal(ks[6], (out_dim, out_dim), dtype) * scale,
        "b3": jax.random.normal(ks[7], (out_dim,), dtype) * scale,
        "gamma": jnp.ones((out_dim,), dtype),   # nn.LayerNorm default init
        "beta": jnp.zeros((out_dim,), dtype),
    }


if __name__ == "__main__":
    N, in_dim, hidden_dim, out_dim, L = 2, 4, 32, 32, 32

    key = jax.random.PRNGKey(0)
    k_x, k_p = jax.random.split(key)
    x = jax.random.normal(k_x, (N, in_dim, L), jnp.float32)
    params = init_params(k_p, in_dim, hidden_dim, out_dim)

    out = jax.jit(audio_encoder_conv1d)(x, params)
    out = jax.block_until_ready(out)

    # expected lengths: L0 = 26, L1 = 22, L2 = (22 + 2 - 4)//2 + 1 = 11
    assert out.shape == (N, out_dim, 11), out.shape
    assert bool(jnp.all(jnp.isfinite(out)))

    ref = _reference_forward(x, params)
    max_err = float(jnp.max(jnp.abs(out - ref)))
    assert max_err < 5e-4, f"mismatch vs reference: {max_err}"

    print("KERNEL_OK")
</pallas_src>

<mosaic_0001>
module attributes {stable_mosaic.version = 11 : i64} {
  func.func @_fused_encoder_kernel(%arg0: i32, %arg1: memref<2x4x32xf32, #tpu.memory_space<vmem>>, %arg2: memref<32x28xf32, #tpu.memory_space<vmem>>, %arg3: memref<32x1xf32, #tpu.memory_space<vmem>>, %arg4: memref<32x160xf32, #tpu.memory_space<vmem>>, %arg5: memref<32x1xf32, #tpu.memory_space<vmem>>, %arg6: memref<32x128xf32, #tpu.memory_space<vmem>>, %arg7: memref<32x1xf32, #tpu.memory_space<vmem>>, %arg8: memref<22x24xf32, #tpu.memory_space<vmem>>, %arg9: memref<32x32xf32, #tpu.memory_space<vmem>>, %arg10: memref<32x1xf32, #tpu.memory_space<vmem>>, %arg11: memref<32x1xf32, #tpu.memory_space<vmem>>, %arg12: memref<32x1xf32, #tpu.memory_space<vmem>>, %arg13: memref<1x32x22xf32, #tpu.memory_space<vmem>>) attributes {dimension_semantics = [#tpu.dimension_semantics<parallel>], iteration_bounds = array<i64: 1>, scalar_prefetch = 0 : i64, scratch_operands = 0 : i64, tpu.core_type = #tpu.core_type<tc>, window_params = [{transform_indices = @transform_0, window_bounds = array<i64: 2, 4, 32>}, {pipeline_mode = #tpu.pipeline_mode<synchronous>, transform_indices = @transform_1, window_bounds = array<i64: 32, 28>}, {pipeline_mode = #tpu.pipeline_mode<synchronous>, transform_indices = @transform_2, window_bounds = array<i64: 32, 1>}, {pipeline_mode = #tpu.pipeline_mode<synchronous>, transform_indices = @transform_3, window_bounds = array<i64: 32, 160>}, {pipeline_mode = #tpu.pipeline_mode<synchronous>, transform_indices = @transform_4, window_bounds = array<i64: 32, 1>}, {pipeline_mode = #tpu.pipeline_mode<synchronous>, transform_indices = @transform_5, window_bounds = array<i64: 32, 128>}, {pipeline_mode = #tpu.pipeline_mode<synchronous>, transform_indices = @transform_6, window_bounds = array<i64: 32, 1>}, {pipeline_mode = #tpu.pipeline_mode<synchronous>, transform_indices = @transform_7, window_bounds = array<i64: 22, 24>}, {pipeline_mode = #tpu.pipeline_mode<synchronous>, transform_indices = @transform_8, window_bounds = array<i64: 32, 32>}, {pipeline_mode = #tpu.pipeline_mode<synchronous>, transform_indices = @transform_9, window_bounds = array<i64: 32, 1>}, {pipeline_mode = #tpu.pipeline_mode<synchronous>, transform_indices = @transform_10, window_bounds = array<i64: 32, 1>}, {pipeline_mode = #tpu.pipeline_mode<synchronous>, transform_indices = @transform_11, window_bounds = array<i64: 32, 1>}, {transform_indices = @transform_12, window_bounds = array<i64: 1, 32, 22>}]} {
    %c0 = arith.constant 0 : index
    %c0_0 = arith.constant 0 : index
    %c0_1 = arith.constant 0 : index
    %0 = vector.load %arg1[%c0, %c0_0, %c0_1] : memref<2x4x32xf32, #tpu.memory_space<vmem>>, vector<1x4x32xf32>
    %1 = vector.shape_cast %0 : vector<1x4x32xf32> to vector<4x32xf32>
    %2 = vector.extract_strided_slice %1 {offsets = [0, 0], sizes = [4, 26], strides = [1, 1]} : vector<4x32xf32> to vector<4x26xf32>
    %3 = vector.extract_strided_slice %1 {offsets = [0, 1], sizes = [4, 26], strides = [1, 1]} : vector<4x32xf32> to vector<4x26xf32>
    %4 = vector.extract_strided_slice %1 {offsets = [0, 2], sizes = [4, 26], strides = [1, 1]} : vector<4x32xf32> to vector<4x26xf32>
    %5 = vector.extract_strided_slice %1 {offsets = [0, 3], sizes = [4, 26], strides = [1, 1]} : vector<4x32xf32> to vector<4x26xf32>
    %6 = vector.extract_strided_slice %1 {offsets = [0, 4], sizes = [4, 26], strides = [1, 1]} : vector<4x32xf32> to vector<4x26xf32>
    %7 = vector.extract_strided_slice %1 {offsets = [0, 5], sizes = [4, 26], strides = [1, 1]} : vector<4x32xf32> to vector<4x26xf32>
    %8 = vector.extract_strided_slice %1 {offsets = [0, 6], sizes = [4, 26], strides = [1, 1]} : vector<4x32xf32> to vector<4x26xf32>
    %9 = tpu.concatenate %2, %3, %4, %5, %6, %7, %8 in 0 : vector<4x26xf32>, vector<4x26xf32>, vector<4x26xf32>, vector<4x26xf32>, vector<4x26xf32>, vector<4x26xf32>, vector<4x26xf32> -> vector<28x26xf32>
    %c1 = arith.constant 1 : index
    %c0_2 = arith.constant 0 : index
    %c0_3 = arith.constant 0 : index
    %10 = vector.load %arg1[%c1, %c0_2, %c0_3] : memref<2x4x32xf32, #tpu.memory_space<vmem>>, vector<1x4x32xf32>
    %11 = vector.shape_cast %10 : vector<1x4x32xf32> to vector<4x32xf32>
    %12 = vector.extract_strided_slice %11 {offsets = [0, 0], sizes = [4, 26], strides = [1, 1]} : vector<4x32xf32> to vector<4x26xf32>
    %13 = vector.extract_strided_slice %11 {offsets = [0, 1], sizes = [4, 26], strides = [1, 1]} : vector<4x32xf32> to vector<4x26xf32>
    %14 = vector.extract_strided_slice %11 {offsets = [0, 2], sizes = [4, 26], strides = [1, 1]} : vector<4x32xf32> to vector<4x26xf32>
    %15 = vector.extract_strided_slice %11 {offsets = [0, 3], sizes = [4, 26], strides = [1, 1]} : vector<4x32xf32> to vector<4x26xf32>
    %16 = vector.extract_strided_slice %11 {offsets = [0, 4], sizes = [4, 26], strides = [1, 1]} : vector<4x32xf32> to vector<4x26xf32>
    %17 = vector.extract_strided_slice %11 {offsets = [0, 5], sizes = [4, 26], strides = [1, 1]} : vector<4x32xf32> to vector<4x26xf32>
    %18 = vector.extract_strided_slice %11 {offsets = [0, 6], sizes = [4, 26], strides = [1, 1]} : vector<4x32xf32> to vector<4x26xf32>
    %19 = tpu.concatenate %12, %13, %14, %15, %16, %17, %18 in 0 : vector<4x26xf32>, vector<4x26xf32>, vector<4x26xf32>, vector<4x26xf32>, vector<4x26xf32>, vector<4x26xf32>, vector<4x26xf32> -> vector<28x26xf32>
    %20 = tpu.concatenate %9, %19 in 1 : vector<28x26xf32>, vector<28x26xf32> -> vector<28x52xf32>
    %c0_4 = arith.constant 0 : index
    %c0_5 = arith.constant 0 : index
    %21 = vector.load %arg2[%c0_4, %c0_5] : memref<32x28xf32, #tpu.memory_space<vmem>>, vector<32x28xf32>
    %cst = arith.constant dense<0.000000e+00> : vector<32x52xf32>
    %22 = tpu.matmul %21, %20, %cst {dimension_numbers = #tpu.dot_dimension_numbers<[1], [0], [0], [1], [0, 0, 1, 1], [], []>} : vector<32x28xf32>, vector<28x52xf32>, vector<32x52xf32> -> vector<32x52xf32>
    %c0_6 = arith.constant 0 : index
    %c0_7 = arith.constant 0 : index
    %23 = vector.load %arg3[%c0_6, %c0_7] : memref<32x1xf32, #tpu.memory_space<vmem>>, vector<32x1xf32>
    %24 = vector.broadcast %23 : vector<32x1xf32> to vector<32x52xf32>
    %25 = arith.addf %22, %24 : vector<32x52xf32>
    %cst_8 = arith.constant 5.000000e-01 : f32
    %26 = vector.broadcast %cst_8 : f32 to vector<32x52xf32>
    %27 = arith.mulf %26, %25 : vector<32x52xf32>
    %cst_9 = arith.constant 0.707106769 : f32
    %28 = vector.broadcast %cst_9 : f32 to vector<32x52xf32>
    %29 = arith.mulf %25, %28 : vector<32x52xf32>
    %cst_10 = arith.constant 0.000000e+00 : f32
    %30 = vector.broadcast %cst_10 : f32 to vector<32x52xf32>
    %31 = arith.cmpf oge, %29, %30 : vector<32x52xf32>
    %cst_11 = arith.constant 1.000000e+00 : f32
    %cst_12 = arith.constant -1.000000e+00 : f32
    %32 = vector.broadcast %cst_11 : f32 to vector<32x52xf32>
    %33 = vector.broadcast %cst_12 : f32 to vector<32x52xf32>
    %34 = arith.select %31, %32, %33 : vector<32x52xi1>, vector<32x52xf32>
    %35 = math.absf %29 : vector<32x52xf32>
    %cst_13 = arith.constant 0.327591091 : f32
    %36 = vector.broadcast %cst_13 : f32 to vector<32x52xf32>
    %37 = arith.mulf %36, %35 : vector<32x52xf32>
    %cst_14 = arith.constant 1.000000e+00 : f32
    %38 = vector.broadcast %cst_14 : f32 to vector<32x52xf32>
    %39 = arith.addf %38, %37 : vector<32x52xf32>
    %cst_15 = arith.constant 1.000000e+00 : f32
    %40 = vector.broadcast %cst_15 : f32 to vector<32x52xf32>
    %41 = arith.divf %40, %39 : vector<32x52xf32>
    %cst_16 = arith.constant 1.06140542 : f32
    %42 = vector.broadcast %cst_16 : f32 to vector<32x52xf32>
    %43 = arith.mulf %42, %41 : vector<32x52xf32>
    %cst_17 = arith.constant -1.45315206 : f32
    %44 = vector.broadcast %cst_17 : f32 to vector<32x52xf32>
    %45 = arith.addf %43, %44 : vector<32x52xf32>
    %46 = arith.mulf %45, %41 : vector<32x52xf32>
    %cst_18 = arith.constant 1.42141378 : f32
    %47 = vector.broadcast %cst_18 : f32 to vector<32x52xf32>
    %48 = arith.addf %46, %47 : vector<32x52xf32>
    %49 = arith.mulf %48, %41 : vector<32x52xf32>
    %cst_19 = arith.constant -0.284496725 : f32
    %50 = vector.broadcast %cst_19 : f32 to vector<32x52xf32>
    %51 = arith.addf %49, %50 : vector<32x52xf32>
    %52 = arith.mulf %51, %41 : vector<32x52xf32>
    %cst_20 = arith.constant 0.254829586 : f32
    %53 = vector.broadcast %cst_20 : f32 to vector<32x52xf32>
    %54 = arith.addf %52, %53 : vector<32x52xf32>
    %55 = arith.mulf %54, %41 : vector<32x52xf32>
    %cst_21 = arith.constant 0.000000e+00 : f32
    %56 = vector.broadcast %cst_21 : f32 to vector<32x52xf32>
    %57 = arith.subf %56, %35 : vector<32x52xf32>
    %58 = arith.mulf %57, %35 : vector<32x52xf32>
    %59 = math.exp %58 : vector<32x52xf32>
    %60 = arith.mulf %55, %59 : vector<32x52xf32>
    %cst_22 = arith.constant 1.000000e+00 : f32
    %61 = vector.broadcast %cst_22 : f32 to vector<32x52xf32>
    %62 = arith.subf %61, %60 : vector<32x52xf32>
    %63 = arith.mulf %34, %62 : vector<32x52xf32>
    %cst_23 = arith.constant 1.000000e+00 : f32
    %64 = vector.broadcast %cst_23 : f32 to vector<32x52xf32>
    %65 = arith.addf %64, %63 : vector<32x52xf32>
    %66 = arith.mulf %27, %65 : vector<32x52xf32>
    %67 = vector.extract_strided_slice %66 {offsets = [0, 0], sizes = [32, 22], strides = [1, 1]} : vector<32x52xf32> to vector<32x22xf32>
    %68 = vector.extract_strided_slice %66 {offsets = [0, 26], sizes = [32, 22], strides = [1, 1]} : vector<32x52xf32> to vector<32x22xf32>
    %69 = tpu.concatenate %67, %68 in 1 : vector<32x22xf32>, vector<32x22xf32> -> vector<32x44xf32>
    %70 = vector.extract_strided_slice %66 {offsets = [0, 1], sizes = [32, 22], strides = [1, 1]} : vector<32x52xf32> to vector<32x22xf32>
    %71 = vector.extract_strided_slice %66 {offsets = [0, 27], sizes = [32, 22], strides = [1, 1]} : vector<32x52xf32> to vector<32x22xf32>
    %72 = tpu.concatenate %70, %71 in 1 : vector<32x22xf32>, vector<32x22xf32> -> vector<32x44xf32>
    %73 = vector.extract_strided_slice %66 {offsets = [0, 2], sizes = [32, 22], strides = [1, 1]} : vector<32x52xf32> to vector<32x22xf32>
    %74 = vector.extract_strided_slice %66 {offsets = [0, 28], sizes = [32, 22], strides = [1, 1]} : vector<32x52xf32> to vector<32x22xf32>
    %75 = tpu.concatenate %73, %74 in 1 : vector<32x22xf32>, vector<32x22xf32> -> vector<32x44xf32>
    %76 = vector.extract_strided_slice %66 {offsets = [0, 3], sizes = [32, 22], strides = [1, 1]} : vector<32x52xf32> to vector<32x22xf32>
    %77 = vector.extract_strided_slice %66 {offsets = [0, 29], sizes = [32, 22], strides = [1, 1]} : vector<32x52xf32> to vector<32x22xf32>
    %78 = tpu.concatenate %76, %77 in 1 : vector<32x22xf32>, vector<32x22xf32> -> vector<32x44xf32>
    %79 = vector.extract_strided_slice %66 {offsets = [0, 4], sizes = [32, 22], strides = [1, 1]} : vector<32x52xf32> to vector<32x22xf32>
    %80 = vector.extract_strided_slice %66 {offsets = [0, 30], sizes = [32, 22], strides = [1, 1]} : vector<32x52xf32> to vector<32x22xf32>
    %81 = tpu.concatenate %79, %80 in 1 : vector<32x22xf32>, vector<32x22xf32> -> vector<32x44xf32>
    %82 = tpu.concatenate %69, %72, %75, %78, %81 in 0 : vector<32x44xf32>, vector<32x44xf32>, vector<32x44xf32>, vector<32x44xf32>, vector<32x44xf32> -> vector<160x44xf32>
    %c0_24 = arith.constant 0 : index
    %c0_25 = arith.constant 0 : index
    %83 = vector.load %arg4[%c0_24, %c0_25] : memref<32x160xf32, #tpu.memory_space<vmem>>, vector<32x160xf32>
    %cst_26 = arith.constant dense<0.000000e+00> : vector<32x44xf32>
    %84 = tpu.matmul %83, %82, %cst_26 {dimension_numbers = #tpu.dot_dimension_numbers<[1], [0], [0], [1], [0, 0, 1, 1], [], []>} : vector<32x160xf32>, vector<160x44xf32>, vector<32x44xf32> -> vector<32x44xf32>
    %c0_27 = arith.constant 0 : index
    %c0_28 = arith.constant 0 : index
    %85 = vector.load %arg5[%c0_27, %c0_28] : memref<32x1xf32, #tpu.memory_space<vmem>>, vector<32x1xf32>
    %86 = vector.broadcast %85 : vector<32x1xf32> to vector<32x44xf32>
    %87 = arith.addf %84, %86 : vector<32x44xf32>
    %cst_29 = arith.constant 5.000000e-01 : f32
    %88 = vector.broadcast %cst_29 : f32 to vector<32x44xf32>
    %89 = arith.mulf %88, %87 : vector<32x44xf32>
    %cst_30 = arith.constant 0.707106769 : f32
    %90 = vector.broadcast %cst_30 : f32 to vector<32x44xf32>
    %91 = arith.mulf %87, %90 : vector<32x44xf32>
    %cst_31 = arith.constant 0.000000e+00 : f32
    %92 = vector.broadcast %cst_31 : f32 to vector<32x44xf32>
    %93 = arith.cmpf oge, %91, %92 : vector<32x44xf32>
    %cst_32 = arith.constant 1.000000e+00 : f32
    %cst_33 = arith.constant -1.000000e+00 : f32
    %94 = vector.broadcast %cst_32 : f32 to vector<32x44xf32>
    %95 = vector.broadcast %cst_33 : f32 to vector<32x44xf32>
    %96 = arith.select %93, %94, %95 : vector<32x44xi1>, vector<32x44xf32>
    %97 = math.absf %91 : vector<32x44xf32>
    %cst_34 = arith.constant 0.327591091 : f32
    %98 = vector.broadcast %cst_34 : f32 to vector<32x44xf32>
    %99 = arith.mulf %98, %97 : vector<32x44xf32>
    %cst_35 = arith.constant 1.000000e+00 : f32
    %100 = vector.broadcast %cst_35 : f32 to vector<32x44xf32>
    %101 = arith.addf %100, %99 : vector<32x44xf32>
    %cst_36 = arith.constant 1.000000e+00 : f32
    %102 = vector.broadcast %cst_36 : f32 to vector<32x44xf32>
    %103 = arith.divf %102, %101 : vector<32x44xf32>
    %cst_37 = arith.constant 1.06140542 : f32
    %104 = vector.broadcast %cst_37 : f32 to vector<32x44xf32>
    %105 = arith.mulf %104, %103 : vector<32x44xf32>
    %cst_38 = arith.constant -1.45315206 : f32
    %106 = vector.broadcast %cst_38 : f32 to vector<32x44xf32>
    %107 = arith.addf %105, %106 : vector<32x44xf32>
    %108 = arith.mulf %107, %103 : vector<32x44xf32>
    %cst_39 = arith.constant 1.42141378 : f32
    %109 = vector.broadcast %cst_39 : f32 to vector<32x44xf32>
    %110 = arith.addf %108, %109 : vector<32x44xf32>
    %111 = arith.mulf %110, %103 : vector<32x44xf32>
    %cst_40 = arith.constant -0.284496725 : f32
    %112 = vector.broadcast %cst_40 : f32 to vector<32x44xf32>
    %113 = arith.addf %111, %112 : vector<32x44xf32>
    %114 = arith.mulf %113, %103 : vector<32x44xf32>
    %cst_41 = arith.constant 0.254829586 : f32
    %115 = vector.broadcast %cst_41 : f32 to vector<32x44xf32>
    %116 = arith.addf %114, %115 : vector<32x44xf32>
    %117 = arith.mulf %116, %103 : vector<32x44xf32>
    %cst_42 = arith.constant 0.000000e+00 : f32
    %118 = vector.broadcast %cst_42 : f32 to vector<32x44xf32>
    %119 = arith.subf %118, %97 : vector<32x44xf32>
    %120 = arith.mulf %119, %97 : vector<32x44xf32>
    %121 = math.exp %120 : vector<32x44xf32>
    %122 = arith.mulf %117, %121 : vector<32x44xf32>
    %cst_43 = arith.constant 1.000000e+00 : f32
    %123 = vector.broadcast %cst_43 : f32 to vector<32x44xf32>
    %124 = arith.subf %123, %122 : vector<32x44xf32>
    %125 = arith.mulf %96, %124 : vector<32x44xf32>
    %cst_44 = arith.constant 1.000000e+00 : f32
    %126 = vector.broadcast %cst_44 : f32 to vector<32x44xf32>
    %127 = arith.addf %126, %125 : vector<32x44xf32>
    %128 = arith.mulf %89, %127 : vector<32x44xf32>
    %c0_45 = arith.constant 0 : index
    %c0_46 = arith.constant 0 : index
    %129 = vector.load %arg8[%c0_45, %c0_46] : memref<22x24xf32, #tpu.memory_space<vmem>>, vector<22x24xf32>
    %130 = vector.extract_strided_slice %128 {offsets = [0, 0], sizes = [32, 22], strides = [1, 1]} : vector<32x44xf32> to vector<32x22xf32>
    %cst_47 = arith.constant dense<0.000000e+00> : vector<32x24xf32>
    %131 = tpu.matmul %130, %129, %cst_47 {dimension_numbers = #tpu.dot_dimension_numbers<[1], [0], [0], [1], [0, 0, 1, 1], [], []>} : vector<32x22xf32>, vector<22x24xf32>, vector<32x24xf32> -> vector<32x24xf32>
    %132 = vector.extract_strided_slice %131 {offsets = [0, 0], sizes = [32, 12], strides = [1, 1]} : vector<32x24xf32> to vector<32x12xf32>
    %133 = vector.extract_strided_slice %131 {offsets = [0, 12], sizes = [32, 12], strides = [1, 1]} : vector<32x24xf32> to vector<32x12xf32>
    %134 = vector.extract_strided_slice %133 {offsets = [0, 0], sizes = [32, 11], strides = [1, 1]} : vector<32x12xf32> to vector<32x11xf32>
    %135 = vector.extract_strided_slice %132 {offsets = [0, 0], sizes = [32, 11], strides = [1, 1]} : vector<32x12xf32> to vector<32x11xf32>
    %136 = vector.extract_strided_slice %133 {offsets = [0, 1], sizes = [32, 11], strides = [1, 1]} : vector<32x12xf32> to vector<32x11xf32>
    %137 = vector.extract_strided_slice %132 {offsets = [0, 1], sizes = [32, 11], strides = [1, 1]} : vector<32x12xf32> to vector<32x11xf32>
    %138 = tpu.concatenate %134, %135, %136, %137 in 0 : vector<32x11xf32>, vector<32x11xf32>, vector<32x11xf32>, vector<32x11xf32> -> vector<128x11xf32>
    %139 = vector.extract_strided_slice %128 {offsets = [0, 22], sizes = [32, 22], strides = [1, 1]} : vector<32x44xf32> to vector<32x22xf32>
    %cst_48 = arith.constant dense<0.000000e+00> : vector<32x24xf32>
    %140 = tpu.matmul %139, %129, %cst_48 {dimension_numbers = #tpu.dot_dimension_numbers<[1], [0], [0], [1], [0, 0, 1, 1], [], []>} : vector<32x22xf32>, vector<22x24xf32>, vector<32x24xf32> -> vector<32x24xf32>
    %141 = vector.extract_strided_slice %140 {offsets = [0, 0], sizes = [32, 12], strides = [1, 1]} : vector<32x24xf32> to vector<32x12xf32>
    %142 = vector.extract_strided_slice %140 {offsets = [0, 12], sizes = [32, 12], strides = [1, 1]} : vector<32x24xf32> to vector<32x12xf32>
    %143 = vector.extract_strided_slice %142 {offsets = [0, 0], sizes = [32, 11], strides = [1, 1]} : vector<32x12xf32> to vector<32x11xf32>
    %144 = vector.extract_strided_slice %141 {offsets = [0, 0], sizes = [32, 11], strides = [1, 1]} : vector<32x12xf32> to vector<32x11xf32>
    %145 = vector.extract_strided_slice %142 {offsets = [0, 1], sizes = [32, 11], strides = [1, 1]} : vector<32x12xf32> to vector<32x11xf32>
    %146 = vector.extract_strided_slice %141 {offsets = [0, 1], sizes = [32, 11], strides = [1, 1]} : vector<32x12xf32> to vector<32x11xf32>
    %147 = tpu.concatenate %143, %144, %145, %146 in 0 : vector<32x11xf32>, vector<32x11xf32>, vector<32x11xf32>, vector<32x11xf32> -> vector<128x11xf32>
    %148 = tpu.concatenate %138, %147 in 1 : vector<128x11xf32>, vector<128x11xf32> -> vector<128x22xf32>
    %c0_49 = arith.constant 0 : index
    %c0_50 = arith.constant 0 : index
    %149 = vector.load %arg6[%c0_49, %c0_50] : memref<32x128xf32, #tpu.memory_space<vmem>>, vector<32x128xf32>
    %cst_51 = arith.constant dense<0.000000e+00> : vector<32x22xf32>
    %150 = tpu.matmul %149, %148, %cst_51 {dimension_numbers = #tpu.dot_dimension_numbers<[1], [0], [0], [1], [0, 0, 1, 1], [], []>} : vector<32x128xf32>, vector<128x22xf32>, vector<32x22xf32> -> vector<32x22xf32>
    %c0_52 = arith.constant 0 : index
    %c0_53 = arith.constant 0 : index
    %151 = vector.load %arg7[%c0_52, %c0_53] : memref<32x1xf32, #tpu.memory_space<vmem>>, vector<32x1xf32>
    %152 = vector.broadcast %151 : vector<32x1xf32> to vector<32x22xf32>
    %153 = arith.addf %150, %152 : vector<32x22xf32>
    %cst_54 = arith.constant 5.000000e-01 : f32
    %154 = vector.broadcast %cst_54 : f32 to vector<32x22xf32>
    %155 = arith.mulf %154, %153 : vector<32x22xf32>
    %cst_55 = arith.constant 0.707106769 : f32
    %156 = vector.broadcast %cst_55 : f32 to vector<32x22xf32>
    %157 = arith.mulf %153, %156 : vector<32x22xf32>
    %cst_56 = arith.constant 0.000000e+00 : f32
    %158 = vector.broadcast %cst_56 : f32 to vector<32x22xf32>
    %159 = arith.cmpf oge, %157, %158 : vector<32x22xf32>
    %cst_57 = arith.constant 1.000000e+00 : f32
    %cst_58 = arith.constant -1.000000e+00 : f32
    %160 = vector.broadcast %cst_57 : f32 to vector<32x22xf32>
    %161 = vector.broadcast %cst_58 : f32 to vector<32x22xf32>
    %162 = arith.select %159, %160, %161 : vector<32x22xi1>, vector<32x22xf32>
    %163 = math.absf %157 : vector<32x22xf32>
    %cst_59 = arith.constant 0.327591091 : f32
    %164 = vector.broadcast %cst_59 : f32 to vector<32x22xf32>
    %165 = arith.mulf %164, %163 : vector<32x22xf32>
    %cst_60 = arith.constant 1.000000e+00 : f32
    %166 = vector.broadcast %cst_60 : f32 to vector<32x22xf32>
    %167 = arith.addf %166, %165 : vector<32x22xf32>
    %cst_61 = arith.constant 1.000000e+00 : f32
    %168 = vector.broadcast %cst_61 : f32 to vector<32x22xf32>
    %169 = arith.divf %168, %167 : vector<32x22xf32>
    %cst_62 = arith.constant 1.06140542 : f32
    %170 = vector.broadcast %cst_62 : f32 to vector<32x22xf32>
    %171 = arith.mulf %170, %169 : vector<32x22xf32>
    %cst_63 = arith.constant -1.45315206 : f32
    %172 = vector.broadcast %cst_63 : f32 to vector<32x22xf32>
    %173 = arith.addf %171, %172 : vector<32x22xf32>
    %174 = arith.mulf %173, %169 : vector<32x22xf32>
    %cst_64 = arith.constant 1.42141378 : f32
    %175 = vector.broadcast %cst_64 : f32 to vector<32x22xf32>
    %176 = arith.addf %174, %175 : vector<32x22xf32>
    %177 = arith.mulf %176, %169 : vector<32x22xf32>
    %cst_65 = arith.constant -0.284496725 : f32
    %178 = vector.broadcast %cst_65 : f32 to vector<32x22xf32>
    %179 = arith.addf %177, %178 : vector<32x22xf32>
    %180 = arith.mulf %179, %169 : vector<32x22xf32>
    %cst_66 = arith.constant 0.254829586 : f32
    %181 = vector.broadcast %cst_66 : f32 to vector<32x22xf32>
    %182 = arith.addf %180, %181 : vector<32x22xf32>
    %183 = arith.mulf %182, %169 : vector<32x22xf32>
    %cst_67 = arith.constant 0.000000e+00 : f32
    %184 = vector.broadcast %cst_67 : f32 to vector<32x22xf32>
    %185 = arith.subf %184, %163 : vector<32x22xf32>
    %186 = arith.mulf %185, %163 : vector<32x22xf32>
    %187 = math.exp %186 : vector<32x22xf32>
    %188 = arith.mulf %183, %187 : vector<32x22xf32>
    %cst_68 = arith.constant 1.000000e+00 : f32
    %189 = vector.broadcast %cst_68 : f32 to vector<32x22xf32>
    %190 = arith.subf %189, %188 : vector<32x22xf32>
    %191 = arith.mulf %162, %190 : vector<32x22xf32>
    %cst_69 = arith.constant 1.000000e+00 : f32
    %192 = vector.broadcast %cst_69 : f32 to vector<32x22xf32>
    %193 = arith.addf %192, %191 : vector<32x22xf32>
    %194 = arith.mulf %155, %193 : vector<32x22xf32>
    %c0_70 = arith.constant 0 : index
    %c0_71 = arith.constant 0 : index
    %195 = vector.load %arg9[%c0_70, %c0_71] : memref<32x32xf32, #tpu.memory_space<vmem>>, vector<32x32xf32>
    %cst_72 = arith.constant dense<0.000000e+00> : vector<32x22xf32>
    %196 = tpu.matmul %195, %194, %cst_72 {dimension_numbers = #tpu.dot_dimension_numbers<[1], [0], [0], [1], [0, 0, 1, 1], [], []>} : vector<32x32xf32>, vector<32x22xf32>, vector<32x22xf32> -> vector<32x22xf32>
    %c0_73 = arith.constant 0 : index
    %c0_74 = arith.constant 0 : index
    %197 = vector.load %arg10[%c0_73, %c0_74] : memref<32x1xf32, #tpu.memory_space<vmem>>, vector<32x1xf32>
    %198 = vector.broadcast %197 : vector<32x1xf32> to vector<32x22xf32>
    %199 = arith.addf %196, %198 : vector<32x22xf32>
    %cst_75 = arith.constant 5.000000e-01 : f32
    %200 = vector.broadcast %cst_75 : f32 to vector<32x22xf32>
    %201 = arith.mulf %200, %199 : vector<32x22xf32>
    %cst_76 = arith.constant 0.707106769 : f32
    %202 = vector.broadcast %cst_76 : f32 to vector<32x22xf32>
    %203 = arith.mulf %199, %202 : vector<32x22xf32>
    %cst_77 = arith.constant 0.000000e+00 : f32
    %204 = vector.broadcast %cst_77 : f32 to vector<32x22xf32>
    %205 = arith.cmpf oge, %203, %204 : vector<32x22xf32>
    %cst_78 = arith.constant 1.000000e+00 : f32
    %cst_79 = arith.constant -1.000000e+00 : f32
    %206 = vector.broadcast %cst_78 : f32 to vector<32x22xf32>
    %207 = vector.broadcast %cst_79 : f32 to vector<32x22xf32>
    %208 = arith.select %205, %206, %207 : vector<32x22xi1>, vector<32x22xf32>
    %209 = math.absf %203 : vector<32x22xf32>
    %cst_80 = arith.constant 0.327591091 : f32
    %210 = vector.broadcast %cst_80 : f32 to vector<32x22xf32>
    %211 = arith.mulf %210, %209 : vector<32x22xf32>
    %cst_81 = arith.constant 1.000000e+00 : f32
    %212 = vector.broadcast %cst_81 : f32 to vector<32x22xf32>
    %213 = arith.addf %212, %211 : vector<32x22xf32>
    %cst_82 = arith.constant 1.000000e+00 : f32
    %214 = vector.broadcast %cst_82 : f32 to vector<32x22xf32>
    %215 = arith.divf %214, %213 : vector<32x22xf32>
    %cst_83 = arith.constant 1.06140542 : f32
    %216 = vector.broadcast %cst_83 : f32 to vector<32x22xf32>
    %217 = arith.mulf %216, %215 : vector<32x22xf32>
    %cst_84 = arith.constant -1.45315206 : f32
    %218 = vector.broadcast %cst_84 : f32 to vector<32x22xf32>
    %219 = arith.addf %217, %218 : vector<32x22xf32>
    %220 = arith.mulf %219, %215 : vector<32x22xf32>
    %cst_85 = arith.constant 1.42141378 : f32
    %221 = vector.broadcast %cst_85 : f32 to vector<32x22xf32>
    %222 = arith.addf %220, %221 : vector<32x22xf32>
    %223 = arith.mulf %222, %215 : vector<32x22xf32>
    %cst_86 = arith.constant -0.284496725 : f32
    %224 = vector.broadcast %cst_86 : f32 to vector<32x22xf32>
    %225 = arith.addf %223, %224 : vector<32x22xf32>
    %226 = arith.mulf %225, %215 : vector<32x22xf32>
    %cst_87 = arith.constant 0.254829586 : f32
    %227 = vector.broadcast %cst_87 : f32 to vector<32x22xf32>
    %228 = arith.addf %226, %227 : vector<32x22xf32>
    %229 = arith.mulf %228, %215 : vector<32x22xf32>
    %cst_88 = arith.constant 0.000000e+00 : f32
    %230 = vector.broadcast %cst_88 : f32 to vector<32x22xf32>
    %231 = arith.subf %230, %209 : vector<32x22xf32>
    %232 = arith.mulf %231, %209 : vector<32x22xf32>
    %233 = math.exp %232 : vector<32x22xf32>
    %234 = arith.mulf %229, %233 : vector<32x22xf32>
    %cst_89 = arith.constant 1.000000e+00 : f32
    %235 = vector.broadcast %cst_89 : f32 to vector<32x22xf32>
    %236 = arith.subf %235, %234 : vector<32x22xf32>
    %237 = arith.mulf %208, %236 : vector<32x22xf32>
    %cst_90 = arith.constant 1.000000e+00 : f32
    %238 = vector.broadcast %cst_90 : f32 to vector<32x22xf32>
    %239 = arith.addf %238, %237 : vector<32x22xf32>
    %240 = arith.mulf %201, %239 : vector<32x22xf32>
    %cst_91 = arith.constant dense<0.000000e+00> : vector<22xf32>
    %241 = vector.multi_reduction <add>, %240, %cst_91 [0] : vector<32x22xf32> to vector<22xf32>
    %242 = vector.shape_cast %241 : vector<22xf32> to vector<1x22xf32>
    %cst_92 = arith.constant 3.200000e+01 : f32
    %243 = vector.broadcast %cst_92 : f32 to vector<1x22xf32>
    %244 = arith.divf %242, %243 : vector<1x22xf32>
    %245 = vector.broadcast %244 : vector<1x22xf32> to vector<32x22xf32>
    %246 = arith.subf %240, %245 : vector<32x22xf32>
    %247 = arith.mulf %246, %246 : vector<32x22xf32>
    %cst_93 = arith.constant dense<0.000000e+00> : vector<22xf32>
    %248 = vector.multi_reduction <add>, %247, %cst_93 [0] : vector<32x22xf32> to vector<22xf32>
    %249 = vector.shape_cast %248 : vector<22xf32> to vector<1x22xf32>
    %cst_94 = arith.constant 3.200000e+01 : f32
    %250 = vector.broadcast %cst_94 : f32 to vector<1x22xf32>
    %251 = arith.divf %249, %250 : vector<1x22xf32>
    %cst_95 = arith.constant 9.99999974E-6 : f32
    %252 = vector.broadcast %cst_95 : f32 to vector<1x22xf32>
    %253 = arith.addf %251, %252 : vector<1x22xf32>
    %254 = math.rsqrt %253 : vector<1x22xf32>
    %255 = vector.broadcast %254 : vector<1x22xf32> to vector<32x22xf32>
    %256 = arith.mulf %246, %255 : vector<32x22xf32>
    %c0_96 = arith.constant 0 : index
    %c0_97 = arith.constant 0 : index
    %257 = vector.load %arg11[%c0_96, %c0_97] : memref<32x1xf32, #tpu.memory_space<vmem>>, vector<32x1xf32>
    %258 = vector.broadcast %257 : vector<32x1xf32> to vector<32x22xf32>
    %259 = arith.mulf %256, %258 : vector<32x22xf32>
    %c0_98 = arith.constant 0 : index
    %c0_99 = arith.constant 0 : index
    %260 = vector.load %arg12[%c0_98, %c0_99] : memref<32x1xf32, #tpu.memory_space<vmem>>, vector<32x1xf32>
    %261 = vector.broadcast %260 : vector<32x1xf32> to vector<32x22xf32>
    %262 = arith.addf %259, %261 : vector<32x22xf32>
    %c0_100 = arith.constant 0 : index
    %c0_101 = arith.constant 0 : index
    %c0_102 = arith.constant 0 : index
    %263 = vector.load %arg13[%c0_100, %c0_101, %c0_102] : memref<1x32x22xf32, #tpu.memory_space<vmem>>, vector<1x32x22xf32>
    %264 = vector.shape_cast %263 : vector<1x32x22xf32> to vector<32x22xf32>
    %265 = vector.shape_cast %262 : vector<32x22xf32> to vector<1x32x22xf32>
    tpu.vector_store %arg13[%c0_100, %c0_101, %c0_102], %265 {strides = array<i32>} : memref<1x32x22xf32, #tpu.memory_space<vmem>>, vector<1x32x22xf32>,
    return
  }
  func.func @transform_0(%arg0: i32) -> (i32, i32, i32) {
    %c0_i32 = arith.constant 0 : i32
    %c0_i32_0 = arith.constant 0 : i32
    %c0_i32_1 = arith.constant 0 : i32
    return %arg0, %c0_i32, %c0_i32_0 : i32, i32, i32
  }
  func.func @transform_1(%arg0: i32) -> (i32, i32) {
    %c0_i32 = arith.constant 0 : i32
    %c0_i32_0 = arith.constant 0 : i32
    %c0_i32_1 = arith.constant 0 : i32
    return %c0_i32, %c0_i32_0 : i32, i32
  }
  func.func @transform_2(%arg0: i32) -> (i32, i32) {
    %c0_i32 = arith.constant 0 : i32
    %c0_i32_0 = arith.constant 0 : i32
    %c0_i32_1 = arith.constant 0 : i32
    return %c0_i32, %c0_i32_0 : i32, i32
  }
  func.func @transform_3(%arg0: i32) -> (i32, i32) {
    %c0_i32 = arith.constant 0 : i32
    %c0_i32_0 = arith.constant 0 : i32
    %c0_i32_1 = arith.constant 0 : i32
    return %c0_i32, %c0_i32_0 : i32, i32
  }
  func.func @transform_4(%arg0: i32) -> (i32, i32) {
    %c0_i32 = arith.constant 0 : i32
    %c0_i32_0 = arith.constant 0 : i32
    %c0_i32_1 = arith.constant 0 : i32
    return %c0_i32, %c0_i32_0 : i32, i32
  }
  func.func @transform_5(%arg0: i32) -> (i32, i32) {
    %c0_i32 = arith.constant 0 : i32
    %c0_i32_0 = arith.constant 0 : i32
    %c0_i32_1 = arith.constant 0 : i32
    return %c0_i32, %c0_i32_0 : i32, i32
  }
  func.func @transform_6(%arg0: i32) -> (i32, i32) {
    %c0_i32 = arith.constant 0 : i32
    %c0_i32_0 = arith.constant 0 : i32
    %c0_i32_1 = arith.constant 0 : i32
    return %c0_i32, %c0_i32_0 : i32, i32
  }
  func.func @transform_7(%arg0: i32) -> (i32, i32) {
    %c0_i32 = arith.constant 0 : i32
    %c0_i32_0 = arith.constant 0 : i32
    %c0_i32_1 = arith.constant 0 : i32
    return %c0_i32, %c0_i32_0 : i32, i32
  }
  func.func @transform_8(%arg0: i32) -> (i32, i32) {
    %c0_i32 = arith.constant 0 : i32
    %c0_i32_0 = arith.constant 0 : i32
    %c0_i32_1 = arith.constant 0 : i32
    return %c0_i32, %c0_i32_0 : i32, i32
  }
  func.func @transform_9(%arg0: i32) -> (i32, i32) {
    %c0_i32 = arith.constant 0 : i32
    %c0_i32_0 = arith.constant 0 : i32
    %c0_i32_1 = arith.constant 0 : i32
    return %c0_i32, %c0_i32_0 : i32, i32
  }
  func.func @transform_10(%arg0: i32) -> (i32, i32) {
    %c0_i32 = arith.constant 0 : i32
    %c0_i32_0 = arith.constant 0 : i32
    %c0_i32_1 = arith.constant 0 : i32
    return %c0_i32, %c0_i32_0 : i32, i32
  }
  func.func @transform_11(%arg0: i32) -> (i32, i32) {
    %c0_i32 = arith.constant 0 : i32
    %c0_i32_0 = arith.constant 0 : i32
    %c0_i32_1 = arith.constant 0 : i32
    return %c0_i32, %c0_i32_0 : i32, i32
  }
  func.func @transform_12(%arg0: i32) -> (i32, i32, i32) {
    %c0_i32 = arith.constant 0 : i32
    %c0_i32_0 = arith.constant 0 : i32
    %c0_i32_1 = arith.constant 0 : i32
    return %arg0, %c0_i32, %c0_i32_0 : i32, i32, i32
  }
}

</mosaic_0001>

<bundles_post_ra>
// kernel: audio_encoder_conv1d.1
= control target key start
LH: loop header
LB: loop body
LE: loop exit
PB: predicated region body
PF: predicated region fallthrough
CT: control target
= control target key end

     0   :  { %s2190_s23 = smov 126   ;;  %s2191_s24 = smov 125   ;;  %vm62_vm0 = vcmask 1043456   ;;  %vm138_vm1 = vcmask 228352   ;;  %v2197_v16 = vmov 0   ;;  %vm105_vm2 = vcmask 211968   ;;  %s2738_s0 = inlined_call_operand.vmem [shape: f32[2,4,32], index: 0, kind: input, shape index: {}]   ;;  %s2739_s1 = inlined_call_operand.vmem [shape: f32[32,28], index: 1, kind: input, shape index: {}]   ;;  %s2740_s2 = inlined_call_operand.vmem [shape: f32[32,1], index: 2, kind: input, shape index: {}]   ;;  %s2741_s4 = inlined_call_operand.vmem [shape: f32[32,1], index: 4, kind: input, shape index: {}]   ;;  %s2742_s3 = inlined_call_operand.vmem [shape: f32[32,160], index: 3, kind: input, shape index: {}]   ;;  %s2743_s7 = inlined_call_operand.vmem [shape: f32[22,24], index: 7, kind: input, shape index: {}]   ;;  %s2744_s6 = inlined_call_operand.vmem [shape: f32[32,1], index: 6, kind: input, shape index: {}]   ;;  %s2745_s9 = inlined_call_operand.vmem [shape: f32[32,1], index: 9, kind: input, shape index: {}]   ;;  %s2746_s10 = inlined_call_operand.vmem [shape: f32[32,1], index: 10, kind: input, shape index: {}]   ;;  %s2747_s11 = inlined_call_operand.vmem [shape: f32[32,1], index: 11, kind: input, shape index: {}]   ;;  %s2748_s5 = inlined_call_operand.vmem [shape: f32[32,128], index: 5, kind: input, shape index: {}]   ;;  %s2749_s8 = inlined_call_operand.vmem [shape: f32[32,32], index: 8, kind: input, shape index: {}]   ;;  %s2750_s12 = inlined_call_operand.vmem [shape: f32[1,32,22], index: 12, kind: output, shape index: {}]  }
   0x1   :  { %v1633_v0 = vld [vmem:[%s2738_s0 + $0x4] sm:$0xf]  ;;  %s2192_s25 = smov 127   ;;  %v41_v2 = vld [vmem:[%s2738_s0] sm:$0xf]  ;;  %s2193_s28 = smov 124   ;;  %1913 = vset.pattern.permute.xlu1 %v2197_v16  ;;  %1912 = vset.pattern.permute.xlu0 %v2197_v16 }
   0x2   :  { %73 = vrot.lane.b32.xlu0 %v1633_v0, %s2190_s23  ;;  %v69_v1 = vrot.slane %v1633_v0, 4  ;;  %s2194_s29 = smov 123   ;;  %v43_v3 = vrot.slane %v41_v2, 4  ;;  %s2195_s30 = smov 122   ;;  %v110_v11 = vld [vmem:[%s2739_s1] sm:$0xff]  ;;  %v115_v17 = vld [vmem:[%s2740_s2 + $0x8] sm:$0xff] }
   0x3   :  { %s2196_s14 = smov 26   ;;  %1715 = vmatprep.mubr.msk.f32.mxu0 %vm138_vm1, %v110_v11  ;;  %v114_v18 = vld [vmem:[%s2740_s2] sm:$0xff]  ;;  %v117_v19 = vld [vmem:[%s2740_s2 + $0x18] sm:$0xff]  ;;  %v116_v20 = vld [vmem:[%s2740_s2 + $0x10] sm:$0xff]  ;;  %vm2198_vm3 = vmmov 1   ;;  %vm500_vm9 = vcmask 261120  }
   0x4   :  { %76 = vrot.lane.b32.xlu1 %v69_v1, %s2191_s24  ;;  %vm1802_vm4 = vmpackc.low %vm62_vm0, %vm2198_vm3  ;;  %v111_v42 = vld [vmem:[%s2739_s1 + $0x8] sm:$0xff]  ;;  %v112_v43 = vld [vmem:[%s2739_s1 + $0x10] sm:$0xff]  ;;  %vm363_vm10 = vcmask 179200   ;;  %vm721_vm11 = vcmask 1045504   ;;  %s2205_s20 = smov 11  }
   0x5   :  { %v113_v44 = vld [vmem:[%s2739_s1 + $0x18] sm:$0xff]  ;;  %s2201_s1 = smov 121  }
   0x6   :  { %70 = vrot.lane.b32.xlu0 %v69_v1, %s2192_s25 }
   0x8   :  { %79 = vrot.lane.b32.xlu1 %v1633_v0, %s2193_s28 }
   0xa   :  { %82 = vrot.lane.b32.xlu0 %v69_v1, %s2194_s29 }
   0xc   :  { %85 = vrot.lane.b32.xlu1 %v1633_v0, %s2195_s30 }
   0xe   :  { %44 = vrot.lane.b32.xlu0 %v43_v3, %s2192_s25 }
  0x10   :  { %47 = vrot.lane.b32.xlu1 %v41_v2, %s2190_s23 }
  0x12   :  { %50 = vrot.lane.b32.xlu0 %v43_v3, %s2191_s24 }
  0x14   :  { %56 = vrot.lane.b32.xlu1 %v43_v3, %s2194_s29 }
  0x16   :  { %53 = vrot.lane.b32.xlu0 %v41_v2, %s2193_s28 }
  0x1a   :  { %59 = vrot.lane.b32.xlu0 %v41_v2, %s2195_s30 }
  0x1e   :  { %120 = vperm.xlu0 %1912, %v114_v18  }
  0x22   :  { %135 = vperm.xlu0 %1912, %v117_v19  }
  0x74   :  { %v74_v4 = vpop.permute.xlu0 %73 }
  0x76   :  { %v77_v5 = vpop.permute.xlu1 %76 }
  0x77   :  { %v88_v7 = vsel %vm62_vm0, %v74_v4, %v77_v5 }
  0x78   :  { %v71_v6 = vpop.permute.xlu0 %70 }
  0x79   :  { %v87_v8 = vsel %vm62_vm0, %v1633_v0, %v71_v6 }
  0x7a   :  { %v1902_v9 = vpack.i.bf16 %v88_v7, %v87_v8  ;;  %v80_v10 = vpop.permute.xlu1 %79 }
  0x7c   :  { %v83_v12 = vpop.permute.xlu0 %82  ;;  %1903 = vrot.lane.b32.xlu1 %v1902_v9, %s2196_s14 }
  0x7d   :  { %v89_v13 = vsel %vm62_vm0, %v80_v10, %v83_v12 }
  0x7e   :  { %v86_v14 = vpop.permute.xlu1 %85 }
  0x7f   :  { %v1907_v15 = vpack.i.bf16 %v86_v14, %v89_v13 }
  0x80   :  { %v45_v22 = vpop.permute.xlu0 %44 }
  0x81   :  { %1908 = vrot.lane.b32.xlu1 %v1907_v15, %s2196_s14  ;;  %v63_v29 = vsel %vm62_vm0, %v41_v2, %v45_v22 }
  0x82   :  { %v48_v21 = vpop.permute.xlu1 %47 }
  0x84   :  { %v51_v24 = vpop.permute.xlu0 %50 }
  0x85   :  { %125 = vperm.xlu1 %1913, %v115_v17   ;;  %v64_v30 = vsel %vm62_vm0, %v48_v21, %v51_v24 }
  0x86   :  { %v57_v23 = vpop.permute.xlu1 %56 }
  0x88   :  { %v54_v26 = vpop.permute.xlu0 %53 }
  0x89   :  { %130 = vperm.xlu1 %1913, %v116_v20   ;;  %v65_v38 = vsel %vm62_vm0, %v54_v26, %v57_v23  ;;  %vm1055_vm0 = vcmask 89088  }
  0x8c   :  { %v60_v35 = vpop.permute.xlu0 %59 }
  0x9d   :  { %v121_v45 = vpop.permute.xlu0 %120 }
  0xa1   :  { %v136_v53 = vpop.permute.xlu0 %135 }
  0xee   :  { %v1904_v25 = vpop.permute.xlu1 %1903 }
  0xef   :  { %v1906_v27 = vunpack.i.h.bf16 %v1904_v25  ;;  %v1905_v28 = vunpack.i.l.bf16 %v1904_v25 }
  0xf1   :  { %v106_v31 = vsel %vm105_vm2, %v63_v29, %v1905_v28  ;;  %v107_v32 = vsel %vm105_vm2, %v64_v30, %v1906_v27 }
  0xf2   :  { %v1797_v33 = vpack.c.bf16 %v107_v32, %v106_v31 }
  0xf3   :  { %v1909_v34 = vpop.permute.xlu1 %1908 }
  0xf4   :  { %v1911_v36 = vunpack.i.h.bf16 %v1909_v34  ;;  %v1910_v37 = vunpack.i.l.bf16 %v1909_v34  ;;  %1798 = vmatprep.subr.bf16.mxu0 %v1797_v33 }
  0xf5   :  { %1800 = vmatpush3.bf16.msra.mxu0 %v1797_v33 }
  0xf6   :  { %v108_v39 = vsel %vm105_vm2, %v65_v38, %v1910_v37  ;;  %v109_v40 = vsel %vm105_vm2, %v60_v35, %v1911_v36 }
  0xf7   :  { %v1801_v41 = vpack.c.bf16 %v109_v40, %v108_v39 }
  0xf9   :  { %1803 = vmatprep.subr.msk.bf16.mxu0 %vm1802_vm4, %v1801_v41 }
  0xfa   :  { %1806 = vmatpush3.bf16.msk.msra.mxu0 %vm1802_vm4, %v1801_v41 }
  0xfd   :  { %1716 = vmatmul.mubr.msk.f32.vlgmr.msra.gmra.mrb[0].mxu0 %vm138_vm1, %v111_v42 }
  0xfe   :  { %1718 = vmatprep.mubr.msk.f32.mxu0 %vm138_vm1, %v112_v43 }
 0x101   :  { %1719 = vmatmul.mubr.msk.f32.gmra.mrb[2].mxu0 %vm138_vm1, %v113_v44 }
 0x104   :  { %v126_v46 = vpop.permute.xlu1 %125 }
 0x108   :  { %v131_v56 = vpop.permute.xlu1 %130 }
 0x1d0   :  { %v1717_v47 = vpop.f32.mrb[0].mxu0 }
 0x1d1   :  { %v2329_v48 = vadd.f32 %v1717_v47, %v126_v46  ;;  %v220_v49 = vpop.f32.mrb[1].mxu0 }
 0x1d2   :  { %v2331_v50 = vadd.f32 %v220_v49, %v121_v45 }
 0x1d3   :  { %v2334_v51 = vmul.f32 0.70710677, %v2329_v48 }
 0x1d4   :  { %v2337_v52 = vmul.f32 0.70710677, %v2331_v50  ;;  %v1720_v54 = vpop.f32.mrb[2].mxu0 }
 0x1d5   :  { %v256_v55 = vand.u32 2147483647, %v2334_v51  ;;  %v2340_v57 = vadd.f32 %v1720_v54, %v136_v53  ;;  %v230_v58 = vpop.f32.mrb[3].mxu0  ;;  %vm248_vm5 = vcmp.ge.f32.partialorder %v2334_v51, 0.0 }
 0x1d6   :  { %v255_v59 = vand.u32 2147483647, %v2337_v52  ;;  %v2343_v60 = vadd.f32 %v230_v58, %v131_v56  ;;  %vm247_vm6 = vcmp.ge.f32.partialorder %v2337_v52, 0.0  ;;  %v240_v52 = vmul.f32 0.5, %v2329_v48 }
 0x1d7   :  { %v260_v61 = vmul.f32 0.3275911, %v256_v55  ;;  %v2346_v63 = vmul.f32 0.70710677, %v2340_v57  ;;  %v312_v8 = vsub.f32 0.0, %v256_v55 }
 0x1d8   :  { %v259_v62 = vmul.f32 0.3275911, %v255_v59  ;;  %v2349_v1 = vmul.f32 0.70710677, %v2343_v60  ;;  %v311_v10 = vsub.f32 0.0, %v255_v59 }
 0x1d9   :  { %v264_v0 = vadd.f32 1.0, %v260_v61  ;;  %v258_v3 = vand.u32 2147483647, %v2346_v63  ;;  %v316_v12 = vmul.f32 %v312_v8, %v256_v55  ;;  %vm250_vm7 = vcmp.ge.f32.partialorder %v2346_v63, 0.0 }
 0x1da   :  { %v263_v2 = vadd.f32 1.0, %v259_v62  ;;  %v257_v5 = vand.u32 2147483647, %v2349_v1  ;;  %v315_v15 = vmul.f32 %v311_v10, %v255_v59  ;;  %vm249_vm8 = vcmp.ge.f32.partialorder %v2349_v1, 0.0 }
 0x1db   :  { %2124 = vrcp.f32 %v264_v0  ;;  %v262_v4 = vmul.f32 0.3275911, %v258_v3  ;;  %v314_v16 = vsub.f32 0.0, %v258_v3  ;;  %v321_v19 = vmul.f32 1.442695, %v316_v12 }
 0x1dc   :  { %2126 = vrcp.f32 %v263_v2  ;;  %v261_v7 = vmul.f32 0.3275911, %v257_v5  ;;  %v313_v21 = vsub.f32 0.0, %v257_v5  ;;  %v319_v24 = vmul.f32 1.442695, %v315_v15 }
 0x1dd   :  { %v266_v6 = vadd.f32 1.0, %v262_v4  ;;  %v318_v25 = vmul.f32 %v314_v16, %v258_v3 }
 0x1de   :  { %v265_v9 = vadd.f32 1.0, %v261_v7  ;;  %v317_v32 = vmul.f32 %v313_v21, %v257_v5  ;;  %v2199_v7 = vmov -1.0  }
 0x1df   :  { %2128 = vrcp.f32 %v266_v6  ;;  %v325_v34 = vmul.f32 1.442695, %v318_v25  ;;  %v252_v8 = vsel %vm248_vm5, 1.0, %v2199_v7  ;;  %v2200_v25 = vmov 0.0|0.0  }
 0x1e0   :  { %2130 = vrcp.f32 %v265_v9  ;;  %v323_v42 = vmul.f32 1.442695, %v317_v32  ;;  %1807 = vmatprep.subr.bf16.mxu1 %v2200_v25  ;;  %v241_v32 = vmul.f32 0.5, %v2343_v60  ;;  %v469_v60 = vld [vmem:[%s2742_s3 + $0x8] sm:$0xff] }
 0x1e1   :  { %2132 = vpow2.f32 %v321_v19  ;;  %v239_v19 = vmul.f32 0.5, %v2331_v50  ;;  %v242_v50 = vmul.f32 0.5, %v2340_v57  ;;  %v476_v57 = vld [vmem:[%s2741_s4] sm:$0xff]  ;;  %1639 = vmatprep.mubr.msk.f32.mxu1 %vm500_vm9, %v469_v60 }
 0x1e2   :  { %2134 = vpow2.f32 %v319_v24 }
 0x1e3   :  { %2136 = vpow2.f32 %v325_v34 }
 0x1e4   :  { %2138 = vpow2.f32 %v323_v42 }
 0x1e5   :  { %v2125_v11 = vpop.eup %2124 }
 0x1e6   :  { %v2127_v13 = vpop.eup %2126  ;;  %v276_v14 = vmul.f32 1.0614054, %v2125_v11 }
 0x1e7   :  { %v275_v17 = vmul.f32 1.0614054, %v2127_v13 }
 0x1e8   :  { %v280_v18 = vadd.f32 -1.4531521, %v276_v14 }
 0x1e9   :  { %v279_v20 = vadd.f32 -1.4531521, %v275_v17  ;;  %v2129_v22 = vpop.eup %2128 }
 0x1ea   :  { %v284_v23 = vmul.f32 %v2125_v11, %v280_v18  ;;  %v278_v27 = vmul.f32 1.0614054, %v2129_v22  ;;  %v2131_v29 = vpop.eup %2130 }
 0x1eb   :  { %v283_v26 = vmul.f32 %v2127_v13, %v279_v20  ;;  %v277_v35 = vmul.f32 1.0614054, %v2131_v29  ;;  %v2133_v58 = vpop.eup %2132 }
 0x1ec   :  { %v288_v28 = vadd.f32 1.4214138, %v284_v23  ;;  %v282_v31 = vadd.f32 -1.4531521, %v278_v27  ;;  %v2135_v62 = vpop.eup %2134 }
 0x1ed   :  { %v287_v30 = vadd.f32 1.4214138, %v283_v26  ;;  %v281_v39 = vadd.f32 -1.4531521, %v277_v35  ;;  %v478_v35 = vld [vmem:[%s2741_s4 + $0x10] sm:$0xff] }
 0x1ee   :  { %v292_v33 = vmul.f32 %v2125_v11, %v288_v28  ;;  %v286_v37 = vmul.f32 %v2129_v22, %v282_v31  ;;  %v253_v28 = vsel %vm249_vm8, 1.0, %v2199_v7 }
 0x1ef   :  { %v291_v36 = vmul.f32 %v2127_v13, %v287_v30  ;;  %v285_v44 = vmul.f32 %v2131_v29, %v281_v39 }
 0x1f0   :  { %v296_v38 = vadd.f32 -0.28449672, %v292_v33  ;;  %v290_v41 = vadd.f32 1.4214138, %v286_v37  ;;  %v479_v37 = vld [vmem:[%s2741_s4 + $0x18] sm:$0xff] }
 0x1f1   :  { %v295_v40 = vadd.f32 -0.28449672, %v291_v36  ;;  %v289_v49 = vadd.f32 1.4214138, %v285_v44  ;;  %v477_v36 = vld [vmem:[%s2741_s4 + $0x8] sm:$0xff]  ;;  %s2206_s4 = smov 116  }
 0x1f2   :  { %v300_v43 = vmul.f32 %v2125_v11, %v296_v38  ;;  %v294_v46 = vmul.f32 %v2129_v22, %v290_v41 }
 0x1f3   :  { %v299_v45 = vmul.f32 %v2127_v13, %v295_v40  ;;  %v293_v56 = vmul.f32 %v2131_v29, %v289_v49 }
 0x1f4   :  { %v304_v47 = vadd.f32 0.2548296, %v300_v43  ;;  %v298_v54 = vadd.f32 -0.28449672, %v294_v46 }
 0x1f5   :  { %v303_v53 = vadd.f32 0.2548296, %v299_v45  ;;  %v297_v2 = vadd.f32 -0.28449672, %v293_v56 }
 0x1f6   :  { %v308_v55 = vmul.f32 %v2125_v11, %v304_v47  ;;  %v302_v61 = vmul.f32 %v2129_v22, %v298_v54  ;;  %v2137_v11 = vpop.eup %2136 }
 0x1f7   :  { %v307_v59 = vmul.f32 %v2127_v13, %v303_v53  ;;  %v301_v6 = vmul.f32 %v2131_v29, %v297_v2  ;;  %v251_v13 = vsel %vm247_vm6, 1.0, %v2199_v7  ;;  %v2139_v18 = vpop.eup %2138 }
 0x1f8   :  { %v328_v0 = vmul.f32 %v2133_v58, %v308_v55  ;;  %v306_v4 = vadd.f32 0.2548296, %v302_v61 }
 0x1f9   :  { %v327_v3 = vmul.f32 %v2135_v62, %v307_v59  ;;  %v305_v14 = vadd.f32 0.2548296, %v301_v6 }
 0x1fa   :  { %v332_v5 = vsub.f32 1.0, %v328_v0  ;;  %v310_v10 = vmul.f32 %v2129_v22, %v306_v4  ;;  %v254_v22 = vsel %vm250_vm7, 1.0, %v2199_v7 }
 0x1fb   :  { %v331_v9 = vsub.f32 1.0, %v327_v3  ;;  %v309_v17 = vmul.f32 %v2131_v29, %v305_v14 }
 0x1fc   :  { %v336_v12 = vmul.f32 %v332_v5, %v252_v8  ;;  %v330_v51 = vmul.f32 %v2137_v11, %v310_v10 }
 0x1fd   :  { %v335_v15 = vmul.f32 %v331_v9, %v251_v13  ;;  %v329_v24 = vmul.f32 %v2139_v18, %v309_v17 }
 0x1fe   :  { %v340_v16 = vadd.f32 1.0, %v336_v12  ;;  %v334_v21 = vsub.f32 1.0, %v330_v51 }
 0x1ff   :  { %v339_v20 = vadd.f32 1.0, %v335_v15  ;;  %v333_v27 = vsub.f32 1.0, %v329_v24 }
 0x200   :  { %v344_v23 = vmul.f32 %v340_v16, %v240_v52  ;;  %v338_v26 = vmul.f32 %v334_v21, %v254_v22 }
 0x201   :  { %v343_v63 = vmul.f32 %v339_v20, %v239_v19  ;;  %v337_v30 = vmul.f32 %v333_v27, %v253_v28 }
 0x202   :  { %v342_v48 = vadd.f32 1.0, %v338_v26 }
 0x203   :  { %v1914_v29 = vpack.i.bf16 %v344_v23, %v343_v63  ;;  %v341_v1 = vadd.f32 1.0, %v337_v30 }
 0x204   :  { %v346_v31 = vmul.f32 %v342_v48, %v242_v50 }
 0x205   :  { %1915 = vrot.lane.b32.xlu1 %v1914_v29, %s2193_s28  ;;  %v345_v33 = vmul.f32 %v341_v1, %v241_v32 }
 0x207   :  { %v1924_v34 = vpack.i.bf16 %v346_v31, %v345_v33 }
 0x209   :  { %1920 = vrot.lane.b32.xlu1 %v1914_v29, %s2192_s25  ;;  %1925 = vrot.lane.b32.xlu0 %v1924_v34, %s2193_s28  ;;  %s2202_s28 = smov 120  }
 0x20d   :  { %1935 = vrot.lane.b32.xlu1 %v1924_v34, %s2192_s25  ;;  %1930 = vrot.lane.b32.xlu0 %v1914_v29, %s2194_s29 }
 0x211   :  { %1940 = vrot.lane.b32.xlu1 %v1914_v29, %s2190_s23  ;;  %1945 = vrot.lane.b32.xlu0 %v1924_v34, %s2194_s29 }
 0x215   :  { %1955 = vrot.lane.b32.xlu1 %v1924_v34, %s2190_s23  ;;  %1950 = vrot.lane.b32.xlu0 %v1914_v29, %s2195_s30 }
 0x219   :  { %1960 = vrot.lane.b32.xlu1 %v1914_v29, %s2191_s24  ;;  %1965 = vrot.lane.b32.xlu0 %v1924_v34, %s2195_s30 }
 0x21d   :  { %1975 = vrot.lane.b32.xlu1 %v1924_v34, %s2191_s24  ;;  %1970 = vrot.lane.b32.xlu0 %v1914_v29, %s2201_s1 }
 0x221   :  { %1985 = vrot.lane.b32.xlu1 %v1914_v29, %s2202_s28  ;;  %1980 = vrot.lane.b32.xlu0 %v1924_v34, %s2201_s1 }
 0x225   :  { %482 = vperm.xlu1 %1913, %v476_v57   ;;  %1990 = vrot.lane.b32.xlu0 %v1924_v34, %s2202_s28 }
 0x229   :  { %492 = vperm.xlu1 %1913, %v478_v35   ;;  %487 = vperm.xlu0 %1912, %v477_v36  }
 0x22d   :  { %497 = vperm.xlu0 %1912, %v479_v37  }
 0x277   :  { %v2394_v38 = vpop.permute.xlu1 %1915 }
 0x278   :  { %v1918_v39 = vunpack.i.h.bf16 %v2394_v38  ;;  %v1917_v40 = vunpack.i.l.bf16 %v2394_v38  ;;  %v468_v38 = vld [vmem:[%s2742_s3] sm:$0xff] }
 0x27a   :  { %v364_v41 = vsel %vm363_vm10, %v343_v63, %v1917_v40  ;;  %v365_v42 = vsel %vm363_vm10, %v344_v23, %v1918_v39 }
 0x27b   :  { %v1921_v43 = vpop.permute.xlu1 %1920  ;;  %v1808_v44 = vpack.c.bf16 %v365_v42, %v364_v41  ;;  %v2404_v45 = vpop.permute.xlu0 %1925 }
 0x27c   :  { %v1928_v46 = vunpack.i.h.bf16 %v2404_v45  ;;  %v1927_v47 = vunpack.i.l.bf16 %v2404_v45  ;;  %v1923_v58 = vunpack.i.h.bf16 %v1921_v43  ;;  %v1922_v59 = vunpack.i.l.bf16 %v1921_v43  ;;  %v470_v45 = vld [vmem:[%s2742_s3 + $0x10] sm:$0xff] }
 0x27d   :  { %1809 = vmatpush1.bf16.msra.mxu1 %v1808_v44 }
 0x27e   :  { %1810 = vmatprep.subr.bf16.mxu1 %v2200_v25  ;;  %v366_v53 = vsel %vm363_vm10, %v345_v33, %v1927_v47  ;;  %v367_v54 = vsel %vm363_vm10, %v346_v31, %v1928_v46 }
 0x27f   :  { %v1936_v49 = vpop.permute.xlu1 %1935  ;;  %v1931_v55 = vpop.permute.xlu0 %1930  ;;  %v1811_v56 = vpack.c.bf16 %v367_v54, %v366_v53 }
 0x280   :  { %v1933_v61 = vunpack.i.h.bf16 %v1931_v55  ;;  %v1932_v62 = vunpack.i.l.bf16 %v1931_v55  ;;  %v1938_v6 = vunpack.i.h.bf16 %v1936_v49  ;;  %v1937_v8 = vunpack.i.l.bf16 %v1936_v49 }
 0x281   :  { %1812 = vmatpush1.bf16.msra.mxu1 %v1811_v56 }
 0x282   :  { %1813 = vmatprep.subr.bf16.mxu1 %v2200_v25  ;;  %v392_v2 = vsel %vm363_vm10, %v1922_v59, %v1932_v62  ;;  %v393_v3 = vsel %vm363_vm10, %v1923_v58, %v1933_v61 }
 0x283   :  { %v1941_v0 = vpop.permute.xlu1 %1940  ;;  %v1946_v4 = vpop.permute.xlu0 %1945  ;;  %v1814_v5 = vpack.c.bf16 %v393_v3, %v392_v2  ;;  %v474_v3 = vld [vmem:[%s2742_s3 + $0x30] sm:$0xff] }
 0x284   :  { %v1948_v9 = vunpack.i.h.bf16 %v1946_v4  ;;  %v1947_v10 = vunpack.i.l.bf16 %v1946_v4  ;;  %v1943_v51 = vunpack.i.h.bf16 %v1941_v0  ;;  %v1942_v52 = vunpack.i.l.bf16 %v1941_v0  ;;  %v706_v4 = vld [vmem:[%s2743_s7] sm:$0xff] }
 0x285   :  { %1815 = vmatpush1.bf16.msra.mxu1 %v1814_v5  ;;  %v707_v5 = vld [vmem:[%s2743_s7 + $0x8] sm:$0xff] }
 0x286   :  { %1816 = vmatprep.subr.bf16.mxu1 %v2200_v25  ;;  %v394_v12 = vsel %vm363_vm10, %v1937_v8, %v1947_v10  ;;  %v395_v13 = vsel %vm363_vm10, %v1938_v6, %v1948_v9  ;;  %v2477_v6 = vpack.c.bf16 %v707_v5, %v706_v4  ;;  %v2484_v8 = vld [vmem:[%s2743_s7 + $0x10] sm:$0x3f]  ;;  %s2204_s7 = smov 12  }
 0x287   :  { %v1956_v11 = vpop.permute.xlu1 %1955  ;;  %v1951_v14 = vpop.permute.xlu0 %1950  ;;  %v1817_v15 = vpack.c.bf16 %v395_v13, %v394_v12 }
 0x288   :  { %v1953_v16 = vunpack.i.h.bf16 %v1951_v14  ;;  %v1952_v17 = vunpack.i.l.bf16 %v1951_v14  ;;  %v1958_v22 = vunpack.i.h.bf16 %v1956_v11  ;;  %v1957_v24 = vunpack.i.l.bf16 %v1956_v11  ;;  %1838 = vmatprep.subr.bf16.mxu0 %v2477_v6 }
 0x289   :  { %1818 = vmatpush1.bf16.msra.mxu1 %v1817_v15  ;;  %1840 = vmatpush3.bf16.msra.mxu0 %v2477_v6 }
 0x28a   :  { %1819 = vmatprep.subr.bf16.mxu1 %v2200_v25  ;;  %v420_v19 = vsel %vm363_vm10, %v1942_v52, %v1952_v17  ;;  %v421_v20 = vsel %vm363_vm10, %v1943_v51, %v1953_v16  ;;  %1725 = vmatprep.subr.msk.mxu0 %vm721_vm11, %v2484_v8 }
 0x28b   :  { %v1961_v18 = vpop.permute.xlu1 %1960  ;;  %v1966_v21 = vpop.permute.xlu0 %1965  ;;  %v1820_v23 = vpack.c.bf16 %v421_v20, %v420_v19 }
 0x28c   :  { %v1968_v63 = vunpack.i.h.bf16 %v1966_v21  ;;  %v1967_v26 = vunpack.i.l.bf16 %v1966_v21  ;;  %v1963_v30 = vunpack.i.h.bf16 %v1961_v18  ;;  %v1962_v31 = vunpack.i.l.bf16 %v1961_v18 }
 0x28d   :  { %1821 = vmatpush1.bf16.msra.mxu1 %v1820_v23  ;;  %1726 = vmatpush3.msk.msra.mxu0 %vm721_vm11, %v2484_v8 }
 0x28e   :  { %1822 = vmatprep.subr.bf16.mxu1 %v2200_v25  ;;  %v422_v48 = vsel %vm363_vm10, %v1957_v24, %v1967_v26  ;;  %v423_v28 = vsel %vm363_vm10, %v1958_v22, %v1968_v63  ;;  %1842 = vmatprep.subr.bf16.mxu0 %v2477_v6 }
 0x28f   :  { %v1976_v27 = vpop.permute.xlu1 %1975  ;;  %v1971_v29 = vpop.permute.xlu0 %1970  ;;  %v1823_v50 = vpack.c.bf16 %v423_v28, %v422_v48 }
 0x290   :  { %v1973_v32 = vunpack.i.h.bf16 %v1971_v29  ;;  %v1972_v1 = vunpack.i.l.bf16 %v1971_v29  ;;  %v1978_v60 = vunpack.i.h.bf16 %v1976_v27  ;;  %v1977_v35 = vunpack.i.l.bf16 %v1976_v27 }
 0x291   :  { %1824 = vmatpush1.bf16.msra.mxu1 %v1823_v50 }
 0x292   :  { %1825 = vmatprep.subr.bf16.mxu1 %v2200_v25  ;;  %v448_v34 = vsel %vm363_vm10, %v1962_v31, %v1972_v1  ;;  %v449_v57 = vsel %vm363_vm10, %v1963_v30, %v1973_v32 }
 0x293   :  { %v1986_v33 = vpop.permute.xlu1 %1985  ;;  %v1981_v36 = vpop.permute.xlu0 %1980  ;;  %v1826_v37 = vpack.c.bf16 %v449_v57, %v448_v34 }
 0x294   :  { %v1988_v41 = vunpack.i.h.bf16 %v1986_v33  ;;  %v1987_v42 = vunpack.i.l.bf16 %v1986_v33  ;;  %v1983_v43 = vunpack.i.h.bf16 %v1981_v36  ;;  %v1982_v44 = vunpack.i.l.bf16 %v1981_v36 }
 0x295   :  { %1827 = vmatpush1.bf16.msra.mxu1 %v1826_v37 }
 0x296   :  { %1828 = vmatprep.subr.bf16.mxu1 %v2200_v25  ;;  %v450_v49 = vsel %vm363_vm10, %v1977_v35, %v1982_v44  ;;  %v451_v53 = vsel %vm363_vm10, %v1978_v60, %v1983_v43  ;;  %v464_v59 = vsel %vm363_vm10, %v1917_v40, %v1987_v42  ;;  %v465_v61 = vsel %vm363_vm10, %v1918_v39, %v1988_v41  ;;  %v471_v39 = vld [vmem:[%s2742_s3 + $0x18] sm:$0xff] }
 0x297   :  { %v1991_v54 = vpop.permute.xlu0 %1990  ;;  %v1829_v55 = vpack.c.bf16 %v451_v53, %v450_v49  ;;  %v1832_v62 = vpack.c.bf16 %v465_v61, %v464_v59 }
 0x298   :  { %v1993_v56 = vunpack.i.h.bf16 %v1991_v54  ;;  %v1992_v58 = vunpack.i.l.bf16 %v1991_v54 }
 0x299   :  { %1830 = vmatpush1.bf16.msra.mxu1 %v1829_v55 }
 0x29a   :  { %1831 = vmatprep.subr.bf16.mxu1 %v2200_v25  ;;  %v466_v0 = vsel %vm363_vm10, %v1927_v47, %v1992_v58  ;;  %v467_v2 = vsel %vm363_vm10, %v1928_v46, %v1993_v56  ;;  %v472_v46 = vld [vmem:[%s2742_s3 + $0x20] sm:$0xff]  ;;  %v475_v47 = vld [vmem:[%s2742_s3 + $0x38] sm:$0xff] }
 0x29b   :  { %v1835_v40 = vpack.c.bf16 %v467_v2, %v466_v0 }
 0x29d   :  { %1833 = vmatpush1.bf16.msra.mxu1 %v1832_v62 }
 0x29e   :  { %1834 = vmatprep.subr.bf16.mxu1 %v2200_v25  ;;  %v473_v25 = vld [vmem:[%s2742_s3 + $0x28] sm:$0xff]  ;;  %s2203_s3 = smov 106  }
 0x2a1   :  { %1836 = vmatpush1.bf16.msra.mxu1 %v1835_v40 }
 0x2a4   :  { %578 = vmatmul.mubr.f32.vlgmr.msra.gmra.mrb[0].mxu1 %v468_v38  ;;  %v483_v9 = vpop.permute.xlu1 %482 }
 0x2a5   :  { %1640 = vmatprep.mubr.msk.f32.mxu1 %vm500_vm9, %v471_v39 }
 0x2a8   :  { %583 = vmatmul.mubr.f32.gmra.mrb[2].mxu1 %v470_v45  ;;  %v488_v14 = vpop.permute.xlu0 %487  ;;  %v493_v20 = vpop.permute.xlu1 %492 }
 0x2a9   :  { %1641 = vmatprep.mubr.msk.f32.mxu1 %vm500_vm9, %v473_v25 }
 0x2ac   :  { %588 = vmatmul.mubr.f32.gmra.mrb[4].mxu1 %v472_v46  ;;  %v498_v26 = vpop.permute.xlu0 %497 }
 0x2ad   :  { %1642 = vmatprep.mubr.msk.f32.mxu1 %vm500_vm9, %v475_v47 }
 0x2b0   :  { %593 = vmatmul.mubr.f32.gmra.mrb[6].mxu1 %v474_v3 }
 0x377   :  { %v579_v10 = vpop.f32.mrb[0].mxu1 }
 0x378   :  { %v2491_v11 = vadd.f32 %v579_v10, %v483_v9  ;;  %v581_v12 = vpop.f32.mrb[1].mxu1 }
 0x37a   :  { %v2494_v13 = vmul.f32 0.70710677, %v2491_v11 }
 0x37b   :  { %v584_v15 = vpop.f32.mrb[2].mxu1 }
 0x37c   :  { %v614_v51 = vand.u32 2147483647, %v2494_v13  ;;  %v2497_v52 = vadd.f32 %v584_v15, %v488_v14  ;;  %v586_v16 = vpop.f32.mrb[3].mxu1  ;;  %vm606_vm12 = vcmp.ge.f32.partialorder %v2494_v13, 0.0  ;;  %v598_v13 = vmul.f32 0.5, %v2491_v11 }
 0x37e   :  { %v618_v17 = vmul.f32 0.3275911, %v614_v51  ;;  %v2500_v18 = vmul.f32 0.70710677, %v2497_v52  ;;  %v670_v1 = vsub.f32 0.0, %v614_v51 }
 0x37f   :  { %v589_v19 = vpop.f32.mrb[4].mxu1 }
 0x380   :  { %v622_v21 = vadd.f32 1.0, %v618_v17  ;;  %v615_v23 = vand.u32 2147483647, %v2500_v18  ;;  %v591_v22 = vpop.f32.mrb[5].mxu1  ;;  %v2503_v24 = vadd.f32 %v589_v19, %v493_v20  ;;  %v674_v35 = vmul.f32 %v670_v1, %v614_v51 }
 0x381   :  { %vm607_vm13 = vcmp.ge.f32.partialorder %v2500_v18, 0.0  ;;  %v599_v18 = vmul.f32 0.5, %v2497_v52 }
 0x382   :  { %2140 = vrcp.f32 %v622_v21  ;;  %v619_v63 = vmul.f32 0.3275911, %v615_v23  ;;  %v2506_v27 = vmul.f32 0.70710677, %v2503_v24  ;;  %v671_v36 = vsub.f32 0.0, %v615_v23 }
 0x383   :  { %v594_v48 = vpop.f32.mrb[6].mxu1  ;;  %v678_v44 = vmul.f32 1.442695, %v674_v35  ;;  %v600_v52 = vmul.f32 0.5, %v2503_v24 }
 0x384   :  { %v623_v28 = vadd.f32 1.0, %v619_v63  ;;  %v2508_v29 = vadd.f32 %v594_v48, %v498_v26  ;;  %v596_v50 = vpop.f32.mrb[7].mxu1  ;;  %v616_v30 = vand.u32 2147483647, %v2506_v27  ;;  %v675_v49 = vmul.f32 %v671_v36, %v615_v23 }
 0x385   :  { %vm608_vm14 = vcmp.ge.f32.partialorder %v2506_v27, 0.0 }
 0x386   :  { %2142 = vrcp.f32 %v623_v28  ;;  %v620_v31 = vmul.f32 0.3275911, %v616_v30  ;;  %v2512_v32 = vmul.f32 0.70710677, %v2508_v29  ;;  %v672_v53 = vsub.f32 0.0, %v616_v30 }
 0x387   :  { %v680_v59 = vmul.f32 1.442695, %v675_v49 }
 0x388   :  { %v624_v33 = vadd.f32 1.0, %v620_v31  ;;  %v617_v34 = vand.u32 2147483647, %v2512_v32  ;;  %v676_v62 = vmul.f32 %v672_v53, %v616_v30  ;;  %v610_v31 = vsel %vm606_vm12, 1.0, %v2199_v7 }
 0x389   :  { %vm609_vm15 = vcmp.ge.f32.partialorder %v2512_v32, 0.0  ;;  %v601_v32 = vmul.f32 0.5, %v2508_v29 }
 0x38a   :  { %2144 = vrcp.f32 %v624_v33  ;;  %v621_v57 = vmul.f32 0.3275911, %v617_v34  ;;  %v673_v0 = vsub.f32 0.0, %v617_v34  ;;  %v682_v47 = vmul.f32 1.442695, %v676_v62 }
 0x38c   :  { %v2141_v60 = vpop.eup %2140  ;;  %v625_v37 = vadd.f32 1.0, %v621_v57  ;;  %v677_v3 = vmul.f32 %v673_v0, %v617_v34 }
 0x38d   :  { %v634_v41 = vmul.f32 1.0614054, %v2141_v60 }
 0x38e   :  { %2146 = vrcp.f32 %v625_v37  ;;  %v684_v16 = vmul.f32 1.442695, %v677_v3 }
 0x38f   :  { %v638_v42 = vadd.f32 -1.4531521, %v634_v41  ;;  %2148 = vpow2.f32 %v678_v44  ;;  %v611_v41 = vsel %vm607_vm13, 1.0, %v2199_v7 }
 0x390   :  { %v2143_v43 = vpop.eup %2142  ;;  %2150 = vpow2.f32 %v680_v59 }
 0x391   :  { %v642_v54 = vmul.f32 %v2141_v60, %v638_v42  ;;  %v635_v55 = vmul.f32 1.0614054, %v2143_v43  ;;  %2152 = vpow2.f32 %v682_v47 }
 0x392   :  { %2154 = vpow2.f32 %v684_v16 }
 0x393   :  { %v646_v56 = vadd.f32 1.4214138, %v642_v54  ;;  %v639_v58 = vadd.f32 -1.4531521, %v635_v55 }
 0x394   :  { %v2145_v61 = vpop.eup %2144 }
 0x395   :  { %v650_v2 = vmul.f32 %v2141_v60, %v646_v56  ;;  %v643_v40 = vmul.f32 %v2143_v43, %v639_v58  ;;  %v636_v38 = vmul.f32 1.0614054, %v2145_v61 }
 0x397   :  { %v654_v39 = vadd.f32 -0.28449672, %v650_v2  ;;  %v647_v45 = vadd.f32 1.4214138, %v643_v40  ;;  %v640_v25 = vadd.f32 -1.4531521, %v636_v38 }
 0x398   :  { %v2147_v46 = vpop.eup %2146  ;;  %v613_v38 = vsel %vm609_vm15, 1.0, %v2199_v7 }
 0x399   :  { %v658_v4 = vmul.f32 %v2141_v60, %v654_v39  ;;  %v651_v5 = vmul.f32 %v2143_v43, %v647_v45  ;;  %v644_v9 = vmul.f32 %v2145_v61, %v640_v25  ;;  %v637_v10 = vmul.f32 1.0614054, %v2147_v46  ;;  %v2149_v20 = vpop.eup %2148 }
 0x39a   :  { %v2151_v30 = vpop.eup %2150 }
 0x39b   :  { %v662_v12 = vadd.f32 0.2548296, %v658_v4  ;;  %v655_v14 = vadd.f32 -0.28449672, %v651_v5  ;;  %v648_v15 = vadd.f32 1.4214138, %v644_v9 }
 0x39c   :  { %v641_v51 = vadd.f32 -1.4531521, %v637_v10 }
 0x39d   :  { %v666_v17 = vmul.f32 %v2141_v60, %v662_v12  ;;  %v659_v19 = vmul.f32 %v2143_v43, %v655_v14  ;;  %v652_v21 = vmul.f32 %v2145_v61, %v648_v15 }
 0x39e   :  { %v645_v23 = vmul.f32 %v2147_v46, %v641_v51 }
 0x39f   :  { %v686_v22 = vmul.f32 %v2149_v20, %v666_v17  ;;  %v663_v63 = vadd.f32 0.2548296, %v659_v19  ;;  %v656_v26 = vadd.f32 -0.28449672, %v652_v21 }
 0x3a0   :  { %v649_v48 = vadd.f32 1.4214138, %v645_v23 }
 0x3a1   :  { %v690_v28 = vsub.f32 1.0, %v686_v22  ;;  %v667_v50 = vmul.f32 %v2143_v43, %v663_v63  ;;  %v660_v1 = vmul.f32 %v2145_v61, %v656_v26  ;;  %v2153_v43 = vpop.eup %2152  ;;  %v1076_v26 = vld [vmem:[%s2744_s6] sm:$0xff] }
 0x3a2   :  { %v653_v33 = vmul.f32 %v2147_v46, %v649_v48  ;;  %v2155_v59 = vpop.eup %2154  ;;  %v1078_v48 = vld [vmem:[%s2744_s6 + $0x10] sm:$0xff] }
 0x3a3   :  { %v694_v34 = vmul.f32 %v690_v28, %v610_v31  ;;  %v687_v57 = vmul.f32 %v2151_v30, %v667_v50  ;;  %v664_v60 = vadd.f32 0.2548296, %v660_v1  ;;  %v1297_v28 = vld [vmem:[%s2745_s9] sm:$0xff]  ;;  %v1299_v50 = vld [vmem:[%s2745_s9 + $0x10] sm:$0xff] }
 0x3a4   :  { %v657_v35 = vadd.f32 -0.28449672, %v653_v33  ;;  %v1569_v30 = vld [vmem:[%s2746_s10] sm:$0xff]  ;;  %v1571_v31 = vld [vmem:[%s2746_s10 + $0x10] sm:$0xff] }
 0x3a5   :  { %v698_v36 = vadd.f32 1.0, %v694_v34  ;;  %v691_v37 = vsub.f32 1.0, %v687_v57  ;;  %v668_v42 = vmul.f32 %v2145_v61, %v664_v60  ;;  %v612_v61 = vsel %vm608_vm14, 1.0, %v2199_v7  ;;  %v1597_v1 = vld [vmem:[%s2747_s11] sm:$0xff]  ;;  %v1599_v33 = vld [vmem:[%s2747_s11 + $0x10] sm:$0xff] }
 0x3a6   :  { %v661_v44 = vmul.f32 %v2147_v46, %v657_v35 }
 0x3a7   :  { %v702_v49 = vmul.f32 %v698_v36, %v598_v13  ;;  %v695_v53 = vmul.f32 %v691_v37, %v611_v41  ;;  %v688_v54 = vmul.f32 %v2153_v43, %v668_v42 }
 0x3a8   :  { %v665_v55 = vadd.f32 0.2548296, %v661_v44 }
 0x3a9   :  { %838 = vrot.lane.b32.xlu1 %v702_v49, %s2203_s3  ;;  %1727 = vmatprep.mubr.msk.f32.mxu0 %vm363_vm10, %v702_v49  ;;  %v699_v11 = vadd.f32 1.0, %v695_v53  ;;  %v692_v56 = vsub.f32 1.0, %v688_v54 }
 0x3aa   :  { %v669_v58 = vmul.f32 %v2147_v46, %v665_v55 }
 0x3ab   :  { %v703_v62 = vmul.f32 %v699_v11, %v599_v18  ;;  %v696_v0 = vmul.f32 %v692_v56, %v612_v61  ;;  %v1072_v18 = vld [vmem:[%s2748_s5] sm:$0xff]  ;;  %v1077_v61 = vld [vmem:[%s2744_s6 + $0x8] sm:$0xff] }
 0x3ac   :  { %v689_v2 = vmul.f32 %v2155_v59, %v669_v58 }
 0x3ad   :  { %840 = vrot.lane.b32.xlu0 %v703_v62, %s2203_s3  ;;  %1728 = vmatmul.mubr.msk.f32.vlgmr.msra.gmra.mrb[4].mxu0 %vm363_vm10, %v703_v62  ;;  %v700_v27 = vadd.f32 1.0, %v696_v0 }
 0x3ae   :  { %v693_v40 = vsub.f32 1.0, %v689_v2  ;;  %1844 = vmatpush3.bf16.msra.mxu0 %v2477_v6 }
 0x3af   :  { %1737 = vmatprep.subr.msk.mxu0 %vm721_vm11, %v2484_v8  ;;  %v704_v39 = vmul.f32 %v700_v27, %v600_v52  ;;  %v1079_v52 = vld [vmem:[%s2744_s6 + $0x18] sm:$0xff]  ;;  %v1298_v27 = vld [vmem:[%s2745_s9 + $0x8] sm:$0xff] }
 0x3b0   :  { %v697_v45 = vmul.f32 %v693_v40, %v613_v38  ;;  %v1300_v40 = vld [vmem:[%s2745_s9 + $0x18] sm:$0xff]  ;;  %v1570_v38 = vld [vmem:[%s2746_s10 + $0x8] sm:$0xff] }
 0x3b1   :  { %842 = vrot.lane.b32.xlu1 %v704_v39, %s2203_s3  ;;  %1730 = vmatprep.mubr.msk.f32.mxu0 %vm363_vm10, %v704_v39  ;;  %v1572_v39 = vld [vmem:[%s2746_s10 + $0x18] sm:$0xff] }
 0x3b2   :  { %v701_v25 = vadd.f32 1.0, %v697_v45  ;;  %1738 = vmatpush3.msk.msra.mxu0 %vm721_vm11, %v2484_v8  ;;  %v1598_v45 = vld [vmem:[%s2747_s11 + $0x8] sm:$0xff] }
 0x3b4   :  { %v705_v24 = vmul.f32 %v701_v25, %v601_v32  ;;  %v1600_v32 = vld [vmem:[%s2747_s11 + $0x18] sm:$0xff] }
 0x3b6   :  { %844 = vrot.lane.b32.xlu0 %v705_v24, %s2203_s3  ;;  %1731 = vmatmul.mubr.msk.f32.gmra.mrb[6].mxu0 %vm363_vm10, %v705_v24 }
 0x41b   :  { %v839_v6 = vpop.permute.xlu1 %838 }
 0x41c   :  { %1739 = vmatprep.mubr.msk.f32.mxu0 %vm363_vm10, %v839_v6 }
 0x41f   :  { %v841_v46 = vpop.permute.xlu0 %840 }
 0x420   :  { %1740 = vmatmul.mubr.msk.f32.vlgmr.msra.gmra.mrb[8].mxu0 %vm363_vm10, %v841_v46 }
 0x423   :  { %v843_v47 = vpop.permute.xlu1 %842 }
 0x424   :  { %1742 = vmatprep.mubr.msk.f32.mxu0 %vm363_vm10, %v843_v47 }
 0x428   :  { %v845_v29 = vpop.permute.xlu0 %844 }
 0x429   :  { %1743 = vmatmul.mubr.msk.f32.gmra.mrb[10].mxu0 %vm363_vm10, %v845_v29 }
 0x42a   :  { %1777 = vmatprep.mubr.f32.mxu0 %v1072_v18 }
 0x480   :  { %v1729_v3 = vpop.f32.mrb[4].mxu0 }
 0x481   :  { %v791_v4 = vpop.f32.mrb[5].mxu0 }
 0x482   :  { %v1994_v5 = vpack.i.bf16 %v1729_v3, %v791_v4 }
 0x484   :  { %1995 = vrot.lane.b32.xlu1 %v1994_v5, %s2204_s7 }
 0x489   :  { %v1732_v8 = vpop.f32.mrb[6].mxu0 }
 0x48a   :  { %v801_v9 = vpop.f32.mrb[7].mxu0 }
 0x48b   :  { %v1999_v10 = vpack.i.bf16 %v1732_v8, %v801_v9 }
 0x48d   :  { %2000 = vrot.lane.b32.xlu1 %v1999_v10, %s2204_s7 }
 0x491   :  { %2005 = vrot.lane.b32.xlu1 %v1994_v5, %s2192_s25 }
 0x495   :  { %2025 = vrot.lane.b32.xlu1 %v1999_v10, %s2192_s25 }
 0x499   :  { %2030 = vrot.lane.b32.xlu1 %v1994_v5, %s2205_s20 }
 0x49d   :  { %2045 = vrot.lane.b32.xlu1 %v1999_v10, %s2205_s20 }
 0x4a1   :  { %2055 = vrot.lane.b32.xlu1 %v1994_v5, %s2206_s4 }
 0x4f3   :  { %v1741_v12 = vpop.f32.mrb[8].mxu0 }
 0x4f4   :  { %v920_v14 = vpop.f32.mrb[9].mxu0 }
 0x4f5   :  { %v2039_v15 = vpack.i.bf16 %v1741_v12, %v920_v14 }
 0x4f6   :  { %v1996_v51 = vpop.permute.xlu1 %1995 }
 0x4f7   :  { %2010 = vrot.lane.b32.xlu0 %v2039_v15, %s2204_s7  ;;  %2065 = vrot.lane.b32.xlu1 %v1996_v51, %s2206_s4 }
 0x4fc   :  { %v1744_v16 = vpop.f32.mrb[10].mxu0 }
 0x4fd   :  { %v930_v17 = vpop.f32.mrb[11].mxu0 }
 0x4fe   :  { %v2049_v19 = vpack.i.bf16 %v1744_v16, %v930_v17 }
 0x4ff   :  { %v2001_v20 = vpop.permute.xlu1 %2000 }
 0x500   :  { %2015 = vrot.lane.b32.xlu0 %v2049_v19, %s2204_s7  ;;  %2070 = vrot.lane.b32.xlu1 %v2001_v20, %s2206_s4 }
 0x503   :  { %v2006_v21 = vpop.permute.xlu1 %2005 }
 0x504   :  { %2020 = vrot.lane.b32.xlu0 %v2039_v15, %s2192_s25  ;;  %2075 = vrot.lane.b32.xlu1 %v2006_v21, %s2206_s4 }
 0x507   :  { %v2026_v23 = vpop.permute.xlu1 %2025 }
 0x508   :  { %2035 = vrot.lane.b32.xlu0 %v2049_v19, %s2192_s25  ;;  %2095 = vrot.lane.b32.xlu1 %v2026_v23, %s2206_s4 }
 0x50b   :  { %v2031_v22 = vpop.permute.xlu1 %2030 }
 0x50c   :  { %2040 = vrot.lane.b32.xlu0 %v2039_v15, %s2205_s20  ;;  %2100 = vrot.lane.b32.xlu1 %v2031_v22, %s2206_s4 }
 0x50f   :  { %v2046_v63 = vpop.permute.xlu1 %2045 }
 0x510   :  { %2050 = vrot.lane.b32.xlu0 %v2049_v19, %s2205_s20  ;;  %2115 = vrot.lane.b32.xlu1 %v2046_v63, %s2206_s4 }
 0x513   :  { %v2056_v60 = vpop.permute.xlu1 %2055 }
 0x514   :  { %2060 = vrot.lane.b32.xlu0 %v1999_v10, %s2206_s4  ;;  %1082 = vperm.xlu1 %1913, %v1076_v26   ;;  %v2058_v13 = vunpack.i.h.bf16 %v2056_v60  ;;  %v2057_v36 = vunpack.i.l.bf16 %v2056_v60 }
 0x518   :  { %1092 = vperm.xlu1 %1913, %v1078_v48  }
 0x51c   :  { %1303 = vperm.xlu1 %1913, %v1297_v28  }
 0x520   :  { %1313 = vperm.xlu1 %1913, %v1299_v50  }
 0x524   :  { %1575 = vperm.xlu1 %1913, %v1569_v30  }
 0x528   :  { %1585 = vperm.xlu1 %1913, %v1571_v31  }
 0x52c   :  { %1603 = vperm.xlu1 %1913, %v1597_v1  }
 0x530   :  { %1613 = vperm.xlu1 %1913, %v1599_v33  }
 0x569   :  { %v2011_v34 = vpop.permute.xlu0 %2010  ;;  %v2066_v25 = vpop.permute.xlu1 %2065 }
 0x56a   :  { %2080 = vrot.lane.b32.xlu0 %v2011_v34, %s2192_s25  ;;  %v2068_v46 = vunpack.i.h.bf16 %v2066_v25  ;;  %v2067_v47 = vunpack.i.l.bf16 %v2066_v25 }
 0x572   :  { %v2016_v57 = vpop.permute.xlu0 %2015  ;;  %v2071_v24 = vpop.permute.xlu1 %2070 }
 0x573   :  { %2085 = vrot.lane.b32.xlu0 %v2016_v57, %s2192_s25  ;;  %v2073_v12 = vunpack.i.h.bf16 %v2071_v24  ;;  %v2072_v14 = vunpack.i.l.bf16 %v2071_v24 }
 0x576   :  { %v2021_v35 = vpop.permute.xlu0 %2020  ;;  %v2076_v9 = vpop.permute.xlu1 %2075 }
 0x577   :  { %v2023_v37 = vunpack.i.h.bf16 %v2021_v35  ;;  %v2022_v41 = vunpack.i.l.bf16 %v2021_v35  ;;  %2090 = vrot.lane.b32.xlu0 %v2021_v35, %s2192_s25  ;;  %v2078_v23 = vunpack.i.h.bf16 %v2076_v9  ;;  %v2077_v22 = vunpack.i.l.bf16 %v2076_v9 }
 0x579   :  { %v1056_v42 = vsel %vm1055_vm0, %v2057_v36, %v2022_v41  ;;  %v1057_v44 = vsel %vm1055_vm0, %v2058_v13, %v2023_v37 }
 0x57a   :  { %v2036_v43 = vpop.permute.xlu0 %2035  ;;  %v1845_v49 = vpack.c.bf16 %v1057_v44, %v1056_v42  ;;  %v2096_v16 = vpop.permute.xlu1 %2095 }
 0x57b   :  { %v2038_v53 = vunpack.i.h.bf16 %v2036_v43  ;;  %v2037_v54 = vunpack.i.l.bf16 %v2036_v43  ;;  %2105 = vrot.lane.b32.xlu0 %v2036_v43, %s2192_s25  ;;  %v2098_v1 = vunpack.i.h.bf16 %v2096_v16  ;;  %v2097_v33 = vunpack.i.l.bf16 %v2096_v16 }
 0x57c   :  { %1846 = vmatprep.subr.bf16.mxu0 %v1845_v49 }
 0x57d   :  { %1848 = vmatpush3.bf16.msra.mxu0 %v1845_v49 }
 0x57e   :  { %v2041_v55 = vpop.permute.xlu0 %2040  ;;  %v2101_v50 = vpop.permute.xlu1 %2100 }
 0x57f   :  { %2110 = vrot.lane.b32.xlu0 %v2041_v55, %s2192_s25  ;;  %v2103_v37 = vunpack.i.h.bf16 %v2101_v50  ;;  %v2102_v41 = vunpack.i.l.bf16 %v2101_v50 }
 0x582   :  { %v2051_v11 = vpop.permute.xlu0 %2050  ;;  %v2116_v43 = vpop.permute.xlu1 %2115 }
 0x583   :  { %2120 = vrot.lane.b32.xlu0 %v2051_v11, %s2192_s25  ;;  %v2118_v18 = vunpack.i.h.bf16 %v2116_v43  ;;  %v2117_v11 = vunpack.i.l.bf16 %v2116_v43 }
 0x586   :  { %v2061_v56 = vpop.permute.xlu0 %2060 }
 0x587   :  { %v2063_v58 = vunpack.i.h.bf16 %v2061_v56  ;;  %v2062_v59 = vunpack.i.l.bf16 %v2061_v56  ;;  %1087 = vperm.xlu0 %1912, %v1077_v61  }
 0x589   :  { %v1058_v62 = vsel %vm1055_vm0, %v2062_v59, %v2037_v54  ;;  %v1059_v0 = vsel %vm1055_vm0, %v2063_v58, %v2038_v53 }
 0x58a   :  { %v1849_v2 = vpack.c.bf16 %v1059_v0, %v1058_v62  ;;  %v1073_v0 = vld [vmem:[%s2748_s5 + $0x8] sm:$0xff] }
 0x58b   :  { %1097 = vperm.xlu0 %1912, %v1079_v52   ;;  %v1075_v52 = vld [vmem:[%s2748_s5 + $0x18] sm:$0xff] }
 0x58c   :  { %1850 = vmatprep.subr.bf16.mxu0 %v1849_v2 }
 0x58d   :  { %1852 = vmatpush3.bf16.msra.mxu0 %v1849_v2  ;;  %v1074_v2 = vld [vmem:[%s2748_s5 + $0x10] sm:$0xff] }
 0x58f   :  { %1308 = vperm.xlu0 %1912, %v1298_v27   ;;  %v1293_v27 = vld [vmem:[%s2749_s8] sm:$0xff] }
 0x590   :  { %1791 = vmatprep.mubr.msk.f32.mxu1 %vm500_vm9, %v1293_v27 }
 0x593   :  { %1318 = vperm.xlu0 %1912, %v1300_v40  }
 0x597   :  { %1580 = vperm.xlu0 %1912, %v1570_v38   ;;  %v1083_v38 = vpop.permute.xlu1 %1082 }
 0x59b   :  { %1590 = vperm.xlu0 %1912, %v1572_v39  }
 0x59f   :  { %1608 = vperm.xlu0 %1912, %v1598_v45  }
 0x5a3   :  { %1618 = vperm.xlu0 %1912, %v1600_v32  }
 0x5dc   :  { %v2081_v6 = vpop.permute.xlu0 %2080 }
 0x5dd   :  { %v2083_v29 = vunpack.i.h.bf16 %v2081_v6  ;;  %v2082_v3 = vunpack.i.l.bf16 %v2081_v6 }
 0x5df   :  { %v1060_v4 = vsel %vm1055_vm0, %v2067_v47, %v2082_v3  ;;  %v1061_v5 = vsel %vm1055_vm0, %v2068_v46, %v2083_v29  ;;  %v1093_v29 = vpop.permute.xlu1 %1092 }
 0x5e0   :  { %v1853_v8 = vpack.c.bf16 %v1061_v5, %v1060_v4 }
 0x5e2   :  { %1854 = vmatprep.subr.bf16.mxu0 %v1853_v8 }
 0x5e3   :  { %1856 = vmatpush3.bf16.msra.mxu0 %v1853_v8 }
 0x5e5   :  { %v2086_v10 = vpop.permute.xlu0 %2085 }
 0x5e6   :  { %v2088_v15 = vunpack.i.h.bf16 %v2086_v10  ;;  %v2087_v51 = vunpack.i.l.bf16 %v2086_v10 }
 0x5e8   :  { %v1062_v17 = vsel %vm1055_vm0, %v2072_v14, %v2087_v51  ;;  %v1063_v19 = vsel %vm1055_vm0, %v2073_v12, %v2088_v15 }
 0x5e9   :  { %v2091_v20 = vpop.permute.xlu0 %2090  ;;  %v1857_v21 = vpack.c.bf16 %v1063_v19, %v1062_v17 }
 0x5ea   :  { %v2093_v63 = vunpack.i.h.bf16 %v2091_v20  ;;  %v2092_v26 = vunpack.i.l.bf16 %v2091_v20 }
 0x5eb   :  { %1858 = vmatprep.subr.bf16.mxu0 %v1857_v21 }
 0x5ec   :  { %1860 = vmatpush3.bf16.msra.mxu0 %v1857_v21  ;;  %v1064_v48 = vsel %vm1055_vm0, %v2077_v22, %v2092_v26  ;;  %v1065_v28 = vsel %vm1055_vm0, %v2078_v23, %v2093_v63 }
 0x5ed   :  { %v2106_v30 = vpop.permute.xlu0 %2105  ;;  %v1861_v31 = vpack.c.bf16 %v1065_v28, %v1064_v48 }
 0x5ee   :  { %v2108_v34 = vunpack.i.h.bf16 %v2106_v30  ;;  %v2107_v57 = vunpack.i.l.bf16 %v2106_v30 }
 0x5ef   :  { %1862 = vmatprep.subr.bf16.mxu0 %v1861_v31 }
 0x5f0   :  { %1864 = vmatpush3.bf16.msra.mxu0 %v1861_v31  ;;  %v1066_v60 = vsel %vm1055_vm0, %v2097_v33, %v2107_v57  ;;  %v1067_v35 = vsel %vm1055_vm0, %v2098_v1, %v2108_v34 }
 0x5f1   :  { %v2111_v13 = vpop.permute.xlu0 %2110  ;;  %v1865_v36 = vpack.c.bf16 %v1067_v35, %v1066_v60 }
 0x5f2   :  { %v2113_v42 = vunpack.i.h.bf16 %v2111_v13  ;;  %v2112_v44 = vunpack.i.l.bf16 %v2111_v13 }
 0x5f3   :  { %1866 = vmatprep.subr.bf16.mxu0 %v1865_v36 }
 0x5f4   :  { %1868 = vmatpush3.bf16.msra.mxu0 %v1865_v36  ;;  %v1068_v49 = vsel %vm1055_vm0, %v2102_v41, %v2112_v44  ;;  %v1069_v53 = vsel %vm1055_vm0, %v2103_v37, %v2113_v42 }
 0x5f5   :  { %v2121_v54 = vpop.permute.xlu0 %2120  ;;  %v1869_v55 = vpack.c.bf16 %v1069_v53, %v1068_v49 }
 0x5f6   :  { %v2123_v56 = vunpack.i.h.bf16 %v2121_v54  ;;  %v2122_v58 = vunpack.i.l.bf16 %v2121_v54 }
 0x5f7   :  { %1870 = vmatprep.subr.bf16.mxu0 %v1869_v55 }
 0x5f8   :  { %1872 = vmatpush3.bf16.msra.mxu0 %v1869_v55  ;;  %v1070_v59 = vsel %vm1055_vm0, %v2117_v11, %v2122_v58  ;;  %v1071_v61 = vsel %vm1055_vm0, %v2118_v18, %v2123_v56 }
 0x5f9   :  { %v1873_v62 = vpack.c.bf16 %v1071_v61, %v1070_v59 }
 0x5fb   :  { %1874 = vmatprep.subr.bf16.mxu0 %v1873_v62 }
 0x5fc   :  { %1876 = vmatpush3.bf16.msra.mxu0 %v1873_v62 }
 0x5ff   :  { %1778 = vmatmul.mubr.f32.vlgmr.msra.gmra.mrb[12].mxu0 %v1073_v0 }
 0x600   :  { %1780 = vmatprep.mubr.f32.mxu0 %v1074_v2 }
 0x603   :  { %1781 = vmatmul.mubr.f32.gmra.mrb[14].mxu0 %v1075_v52 }
 0x606   :  { %v1088_v40 = vpop.permute.xlu0 %1087 }
 0x60a   :  { %v1098_v6 = vpop.permute.xlu0 %1097 }
 0x6d2   :  { %v1779_v39 = vpop.f32.mrb[12].mxu0 }
 0x6d3   :  { %v2630_v45 = vadd.f32 %v1779_v39, %v1088_v40  ;;  %v1166_v32 = vpop.f32.mrb[13].mxu0 }
 0x6d4   :  { %v2632_v25 = vadd.f32 %v1166_v32, %v1083_v38 }
 0x6d5   :  { %v2635_v24 = vmul.f32 0.70710677, %v2630_v45 }
 0x6d6   :  { %v2638_v46 = vmul.f32 0.70710677, %v2632_v25  ;;  %v1782_v47 = vpop.f32.mrb[14].mxu0 }
 0x6d7   :  { %v1202_v3 = vand.u32 2147483647, %v2635_v24  ;;  %v2641_v4 = vadd.f32 %v1782_v47, %v1098_v6  ;;  %v1176_v5 = vpop.f32.mrb[15].mxu0  ;;  %vm1194_vm1 = vcmp.ge.f32.partialorder %v2635_v24, 0.0 }
 0x6d8   :  { %v1201_v8 = vand.u32 2147483647, %v2638_v46  ;;  %v2644_v9 = vadd.f32 %v1176_v5, %v1093_v29  ;;  %vm1193_vm2 = vcmp.ge.f32.partialorder %v2638_v46, 0.0 }
 0x6d9   :  { %v1206_v10 = vmul.f32 0.3275911, %v1202_v3  ;;  %v2647_v14 = vmul.f32 0.70710677, %v2641_v4  ;;  %v1258_v22 = vsub.f32 0.0, %v1202_v3 }
 0x6da   :  { %v1205_v12 = vmul.f32 0.3275911, %v1201_v8  ;;  %v2650_v51 = vmul.f32 0.70710677, %v2644_v9  ;;  %v1257_v26 = vsub.f32 0.0, %v1201_v8 }
 0x6db   :  { %v1210_v15 = vadd.f32 1.0, %v1206_v10  ;;  %v1204_v17 = vand.u32 2147483647, %v2647_v14  ;;  %v1262_v28 = vmul.f32 %v1258_v22, %v1202_v3  ;;  %v1198_v22 = vsel %vm1194_vm1, 1.0, %v2199_v7 }
 0x6dc   :  { %v1209_v16 = vadd.f32 1.0, %v1205_v12  ;;  %v1203_v20 = vand.u32 2147483647, %v2650_v51  ;;  %v1261_v31 = vmul.f32 %v1257_v26, %v1201_v8  ;;  %vm1196_vm3 = vcmp.ge.f32.partialorder %v2647_v14, 0.0 }
 0x6dd   :  { %2156 = vrcp.f32 %v1210_v15  ;;  %v1208_v19 = vmul.f32 0.3275911, %v1204_v17  ;;  %v1260_v1 = vsub.f32 0.0, %v1204_v17  ;;  %v1267_v57 = vmul.f32 1.442695, %v1262_v28 }
 0x6de   :  { %2158 = vrcp.f32 %v1209_v16  ;;  %v1207_v23 = vmul.f32 0.3275911, %v1203_v20  ;;  %v1259_v35 = vsub.f32 0.0, %v1203_v20  ;;  %v1265_v37 = vmul.f32 1.442695, %v1261_v31 }
 0x6df   :  { %v1212_v21 = vadd.f32 1.0, %v1208_v19  ;;  %v1264_v41 = vmul.f32 %v1260_v1, %v1204_v17  ;;  %v1186_v1 = vmul.f32 0.5, %v2630_v45  ;;  %vm1195_vm4 = vcmp.ge.f32.partialorder %v2650_v51, 0.0  ;;  %v1294_v51 = vld [vmem:[%s2749_s8 + $0x8] sm:$0xff] }
 0x6e0   :  { %v1211_v63 = vadd.f32 1.0, %v1207_v23  ;;  %v1263_v55 = vmul.f32 %v1259_v35, %v1203_v20 }
 0x6e1   :  { %2160 = vrcp.f32 %v1212_v21  ;;  %v1271_v11 = vmul.f32 1.442695, %v1264_v41 }
 0x6e2   :  { %2162 = vrcp.f32 %v1211_v63  ;;  %v1269_v52 = vmul.f32 1.442695, %v1263_v55 }
 0x6e3   :  { %2164 = vpow2.f32 %v1267_v57  ;;  %v1185_v57 = vmul.f32 0.5, %v2632_v25 }
 0x6e4   :  { %2166 = vpow2.f32 %v1265_v37 }
 0x6e5   :  { %2168 = vpow2.f32 %v1271_v11 }
 0x6e6   :  { %2170 = vpow2.f32 %v1269_v52 }
 0x6e7   :  { %v2157_v48 = vpop.eup %2156 }
 0x6e8   :  { %v2159_v50 = vpop.eup %2158  ;;  %v1222_v30 = vmul.f32 1.0614054, %v2157_v48 }
 0x6e9   :  { %v1221_v33 = vmul.f32 1.0614054, %v2159_v50 }
 0x6ea   :  { %v1226_v34 = vadd.f32 -1.4531521, %v1222_v30 }
 0x6eb   :  { %v1225_v60 = vadd.f32 -1.4531521, %v1221_v33  ;;  %v2161_v13 = vpop.eup %2160 }
 0x6ec   :  { %v1230_v36 = vmul.f32 %v2157_v48, %v1226_v34  ;;  %v1224_v44 = vmul.f32 1.0614054, %v2161_v13  ;;  %v2163_v49 = vpop.eup %2162 }
 0x6ed   :  { %v1229_v42 = vmul.f32 %v2159_v50, %v1225_v60  ;;  %v1223_v56 = vmul.f32 1.0614054, %v2163_v49  ;;  %v2165_v8 = vpop.eup %2164 }
 0x6ee   :  { %v1234_v43 = vadd.f32 1.4214138, %v1230_v36  ;;  %v1228_v54 = vadd.f32 -1.4531521, %v1224_v44  ;;  %v2167_v15 = vpop.eup %2166 }
 0x6ef   :  { %v1233_v53 = vadd.f32 1.4214138, %v1229_v42  ;;  %v1227_v62 = vadd.f32 -1.4531521, %v1223_v56  ;;  %v1295_v56 = vld [vmem:[%s2749_s8 + $0x10] sm:$0xff] }
 0x6f0   :  { %v1238_v18 = vmul.f32 %v2157_v48, %v1234_v43  ;;  %v1232_v59 = vmul.f32 %v2161_v13, %v1228_v54  ;;  %v1199_v43 = vsel %vm1195_vm4, 1.0, %v2199_v7  ;;  %v1187_v54 = vmul.f32 0.5, %v2644_v9  ;;  %v1309_v9 = vpop.permute.xlu0 %1308 }
 0x6f1   :  { %v1237_v58 = vmul.f32 %v2159_v50, %v1233_v53  ;;  %v1231_v40 = vmul.f32 %v2163_v49, %v1227_v62 }
 0x6f2   :  { %v1242_v61 = vadd.f32 -0.28449672, %v1238_v18  ;;  %v1236_v2 = vadd.f32 1.4214138, %v1232_v59 }
 0x6f3   :  { %v1241_v0 = vadd.f32 -0.28449672, %v1237_v58  ;;  %v1235_v6 = vadd.f32 1.4214138, %v1231_v40  ;;  %v1304_v58 = vpop.permute.xlu1 %1303 }
 0x6f4   :  { %v1246_v27 = vmul.f32 %v2157_v48, %v1242_v61  ;;  %v1240_v39 = vmul.f32 %v2161_v13, %v1236_v2  ;;  %v1319_v52 = vpop.permute.xlu0 %1318 }
 0x6f5   :  { %v1245_v38 = vmul.f32 %v2159_v50, %v1241_v0  ;;  %v1239_v5 = vmul.f32 %v2163_v49, %v1235_v6 }
 0x6f6   :  { %v1250_v32 = vadd.f32 0.2548296, %v1246_v27  ;;  %v1244_v29 = vadd.f32 -0.28449672, %v1240_v39 }
 0x6f7   :  { %v1249_v47 = vadd.f32 0.2548296, %v1245_v38  ;;  %v1243_v17 = vadd.f32 -0.28449672, %v1239_v5  ;;  %v1314_v38 = vpop.permute.xlu1 %1313 }
 0x6f8   :  { %v1254_v3 = vmul.f32 %v2157_v48, %v1250_v32  ;;  %v1248_v12 = vmul.f32 %v2161_v13, %v1244_v29  ;;  %v2169_v48 = vpop.eup %2168 }
 0x6f9   :  { %v1253_v10 = vmul.f32 %v2159_v50, %v1249_v47  ;;  %v1247_v23 = vmul.f32 %v2163_v49, %v1243_v17  ;;  %v1197_v50 = vsel %vm1193_vm2, 1.0, %v2199_v7  ;;  %v2171_v34 = vpop.eup %2170 }
 0x6fa   :  { %v1274_v16 = vmul.f32 %v2165_v8, %v1254_v3  ;;  %v1252_v20 = vadd.f32 0.2548296, %v1248_v12 }
 0x6fb   :  { %v1273_v19 = vmul.f32 %v2167_v15, %v1253_v10  ;;  %v1251_v30 = vadd.f32 0.2548296, %v1247_v23 }
 0x6fc   :  { %v1278_v21 = vsub.f32 1.0, %v1274_v16  ;;  %v1256_v26 = vmul.f32 %v2161_v13, %v1252_v20  ;;  %v1200_v13 = vsel %vm1196_vm3, 1.0, %v2199_v7 }
 0x6fd   :  { %v1277_v63 = vsub.f32 1.0, %v1273_v19  ;;  %v1255_v33 = vmul.f32 %v2163_v49, %v1251_v30  ;;  %v1188_v49 = vmul.f32 0.5, %v2641_v4  ;;  %v1296_v4 = vld [vmem:[%s2749_s8 + $0x18] sm:$0xff] }
 0x6fe   :  { %v1282_v28 = vmul.f32 %v1278_v21, %v1198_v22  ;;  %v1276_v24 = vmul.f32 %v2169_v48, %v1256_v26 }
 0x6ff   :  { %v1281_v31 = vmul.f32 %v1277_v63, %v1197_v50  ;;  %v1275_v37 = vmul.f32 %v2171_v34, %v1255_v33 }
 0x700   :  { %v1286_v46 = vadd.f32 1.0, %v1282_v28  ;;  %v1280_v35 = vsub.f32 1.0, %v1276_v24 }
 0x701   :  { %v1285_v60 = vadd.f32 1.0, %v1281_v31  ;;  %v1279_v44 = vsub.f32 1.0, %v1275_v37 }
 0x702   :  { %v1290_v36 = vmul.f32 %v1286_v46, %v1186_v1  ;;  %v1284_v42 = vmul.f32 %v1280_v35, %v1200_v13 }
 0x703   :  { %v1289_v41 = vmul.f32 %v1285_v60, %v1185_v57  ;;  %v1283_v53 = vmul.f32 %v1279_v44, %v1199_v43 }
 0x704   :  { %v1288_v14 = vadd.f32 1.0, %v1284_v42 }
 0x705   :  { %v1877_v45 = vpack.c.bf16 %v1290_v36, %v1289_v41  ;;  %v1287_v55 = vadd.f32 1.0, %v1283_v53 }
 0x706   :  { %v1292_v25 = vmul.f32 %v1288_v14, %v1188_v49 }
 0x707   :  { %1878 = vmatprep.subr.bf16.mxu1 %v1877_v45  ;;  %v1291_v18 = vmul.f32 %v1287_v55, %v1187_v54 }
 0x708   :  { %1880 = vmatpush3.bf16.msra.mxu1 %v1877_v45 }
 0x709   :  { %v1881_v11 = vpack.c.bf16 %v1292_v25, %v1291_v18 }
 0x70b   :  { %1882 = vmatprep.subr.bf16.mxu1 %v1881_v11 }
 0x70c   :  { %1884 = vmatpush3.bf16.msra.mxu1 %v1881_v11 }
 0x70f   :  { %1792 = vmatmul.mubr.msk.f32.vlgmr.msra.gmra.mrb[8].mxu1 %vm500_vm9, %v1294_v51 }
 0x710   :  { %1794 = vmatprep.mubr.msk.f32.mxu1 %vm500_vm9, %v1295_v56 }
 0x713   :  { %1795 = vmatmul.mubr.msk.f32.gmra.mrb[10].mxu1 %vm500_vm9, %v1296_v4 }
 0x7e2   :  { %v1793_v59 = vpop.f32.mrb[8].mxu1 }
 0x7e3   :  { %v2678_v61 = vadd.f32 %v1793_v59, %v1309_v9  ;;  %v1399_v62 = vpop.f32.mrb[9].mxu1 }
 0x7e4   :  { %v2680_v0 = vadd.f32 %v1399_v62, %v1304_v58 }
 0x7e5   :  { %v2683_v2 = vmul.f32 0.70710677, %v2678_v61 }
 0x7e6   :  { %v2686_v27 = vmul.f32 0.70710677, %v2680_v0  ;;  %v1796_v40 = vpop.f32.mrb[10].mxu1 }
 0x7e7   :  { %v1435_v39 = vand.u32 2147483647, %v2683_v2  ;;  %v2689_v32 = vadd.f32 %v1796_v40, %v1319_v52  ;;  %v1409_v6 = vpop.f32.mrb[11].mxu1  ;;  %vm1427_vm5 = vcmp.ge.f32.partialorder %v2683_v2, 0.0 }
 0x7e8   :  { %v1434_v47 = vand.u32 2147483647, %v2686_v27  ;;  %v2692_v29 = vadd.f32 %v1409_v6, %v1314_v38  ;;  %vm1426_vm6 = vcmp.ge.f32.partialorder %v2686_v27, 0.0 }
 0x7e9   :  { %v1439_v3 = vmul.f32 0.3275911, %v1435_v39  ;;  %v2695_v8 = vmul.f32 0.70710677, %v2689_v32  ;;  %v1491_v23 = vsub.f32 0.0, %v1435_v39 }
 0x7ea   :  { %v1438_v5 = vmul.f32 0.3275911, %v1434_v47  ;;  %v2698_v12 = vmul.f32 0.70710677, %v2692_v29  ;;  %v1490_v63 = vsub.f32 0.0, %v1434_v47 }
 0x7eb   :  { %v1443_v10 = vadd.f32 1.0, %v1439_v3  ;;  %v1437_v16 = vand.u32 2147483647, %v2695_v8  ;;  %v1495_v48 = vmul.f32 %v1491_v23, %v1435_v39  ;;  %v1431_v23 = vsel %vm1427_vm5, 1.0, %v2199_v7 }
 0x7ec   :  { %v1442_v15 = vadd.f32 1.0, %v1438_v5  ;;  %v1436_v19 = vand.u32 2147483647, %v2698_v12  ;;  %v1494_v30 = vmul.f32 %v1490_v63, %v1434_v47  ;;  %vm1429_vm7 = vcmp.ge.f32.partialorder %v2695_v8, 0.0 }
 0x7ed   :  { %2172 = vrcp.f32 %v1443_v10  ;;  %v1441_v17 = vmul.f32 0.3275911, %v1437_v16  ;;  %v1493_v31 = vsub.f32 0.0, %v1437_v16  ;;  %v1500_v46 = vmul.f32 1.442695, %v1495_v48 }
 0x7ee   :  { %2174 = vrcp.f32 %v1442_v15  ;;  %v1440_v21 = vmul.f32 0.3275911, %v1436_v19  ;;  %v1492_v34 = vsub.f32 0.0, %v1436_v19  ;;  %v1498_v35 = vmul.f32 1.442695, %v1494_v30 }
 0x7ef   :  { %v1445_v20 = vadd.f32 1.0, %v1441_v17  ;;  %v1497_v36 = vmul.f32 %v1493_v31, %v1437_v16  ;;  %v1419_v31 = vmul.f32 0.5, %v2678_v61  ;;  %vm1428_vm8 = vcmp.ge.f32.partialorder %v2698_v12, 0.0 }
 0x7f0   :  { %v1444_v22 = vadd.f32 1.0, %v1440_v21  ;;  %v1496_v43 = vmul.f32 %v1492_v34, %v1436_v19 }
 0x7f1   :  { %2176 = vrcp.f32 %v1445_v20  ;;  %v1504_v49 = vmul.f32 1.442695, %v1497_v36 }
 0x7f2   :  { %2178 = vrcp.f32 %v1444_v22  ;;  %v1502_v56 = vmul.f32 1.442695, %v1496_v43  ;;  %v1420_v43 = vmul.f32 0.5, %v2692_v29 }
 0x7f3   :  { %2180 = vpow2.f32 %v1500_v46  ;;  %v1418_v46 = vmul.f32 0.5, %v2680_v0 }
 0x7f4   :  { %2182 = vpow2.f32 %v1498_v35 }
 0x7f5   :  { %2184 = vpow2.f32 %v1504_v49 }
 0x7f6   :  { %2186 = vpow2.f32 %v1502_v56 }
 0x7f7   :  { %v2173_v26 = vpop.eup %2172 }
 0x7f8   :  { %v2175_v28 = vpop.eup %2174  ;;  %v1455_v50 = vmul.f32 1.0614054, %v2173_v26 }
 0x7f9   :  { %v1454_v24 = vmul.f32 1.0614054, %v2175_v28 }
 0x7fa   :  { %v1459_v1 = vadd.f32 -1.4531521, %v1455_v50 }
 0x7fb   :  { %v1458_v33 = vadd.f32 -1.4531521, %v1454_v24  ;;  %v2177_v57 = vpop.eup %2176 }
 0x7fc   :  { %v1463_v60 = vmul.f32 %v2173_v26, %v1459_v1  ;;  %v1457_v37 = vmul.f32 1.0614054, %v2177_v57  ;;  %v2179_v42 = vpop.eup %2178 }
 0x7fd   :  { %v1462_v13 = vmul.f32 %v2175_v28, %v1458_v33  ;;  %v1456_v53 = vmul.f32 1.0614054, %v2179_v42  ;;  %v2181_v47 = vpop.eup %2180 }
 0x7fe   :  { %v1467_v41 = vadd.f32 1.4214138, %v1463_v60  ;;  %v1461_v14 = vadd.f32 -1.4531521, %v1457_v37  ;;  %v2183_v10 = vpop.eup %2182 }
 0x7ff   :  { %v1466_v44 = vadd.f32 1.4214138, %v1462_v13  ;;  %v1460_v18 = vadd.f32 -1.4531521, %v1456_v53 }
 0x800   :  { %v1471_v45 = vmul.f32 %v2173_v26, %v1467_v41  ;;  %v1465_v54 = vmul.f32 %v2177_v57, %v1461_v14  ;;  %v1432_v41 = vsel %vm1428_vm8, 1.0, %v2199_v7  ;;  %v1421_v14 = vmul.f32 0.5, %v2689_v32 }
 0x801   :  { %v1470_v25 = vmul.f32 %v2175_v28, %v1466_v44  ;;  %v1464_v9 = vmul.f32 %v2179_v42, %v1460_v18 }
 0x802   :  { %v1475_v55 = vadd.f32 -0.28449672, %v1471_v45  ;;  %v1469_v51 = vadd.f32 1.4214138, %v1465_v54 }
 0x803   :  { %v1474_v11 = vadd.f32 -0.28449672, %v1470_v25  ;;  %v1468_v52 = vadd.f32 1.4214138, %v1464_v9 }
 0x804   :  { %v1479_v4 = vmul.f32 %v2173_v26, %v1475_v55  ;;  %v1473_v59 = vmul.f32 %v2177_v57, %v1469_v51 }
 0x805   :  { %v1478_v58 = vmul.f32 %v2175_v28, %v1474_v11  ;;  %v1472_v6 = vmul.f32 %v2179_v42, %v1468_v52 }
 0x806   :  { %v1483_v62 = vadd.f32 0.2548296, %v1479_v4  ;;  %v1477_v38 = vadd.f32 -0.28449672, %v1473_v59 }
 0x807   :  { %v1482_v40 = vadd.f32 0.2548296, %v1478_v58  ;;  %v1476_v16 = vadd.f32 -0.28449672, %v1472_v6 }
 0x808   :  { %v1487_v39 = vmul.f32 %v2173_v26, %v1483_v62  ;;  %v1481_v5 = vmul.f32 %v2177_v57, %v1477_v38  ;;  %v2185_v26 = vpop.eup %2184 }
 0x809   :  { %v1486_v3 = vmul.f32 %v2175_v28, %v1482_v40  ;;  %v1480_v21 = vmul.f32 %v2179_v42, %v1476_v16  ;;  %v1430_v28 = vsel %vm1426_vm6, 1.0, %v2199_v7  ;;  %v2187_v1 = vpop.eup %2186 }
 0x80a   :  { %v1507_v15 = vmul.f32 %v2181_v47, %v1487_v39  ;;  %v1485_v19 = vadd.f32 0.2548296, %v1481_v5 }
 0x80b   :  { %v1506_v17 = vmul.f32 %v2183_v10, %v1486_v3  ;;  %v1484_v50 = vadd.f32 0.2548296, %v1480_v21 }
 0x80c   :  { %v1511_v20 = vsub.f32 1.0, %v1507_v15  ;;  %v1489_v63 = vmul.f32 %v2177_v57, %v1485_v19  ;;  %v1433_v57 = vsel %vm1429_vm7, 1.0, %v2199_v7 }
 0x80d   :  { %v1510_v22 = vsub.f32 1.0, %v1506_v17  ;;  %v1488_v24 = vmul.f32 %v2179_v42, %v1484_v50 }
 0x80e   :  { %v1515_v48 = vmul.f32 %v1511_v20, %v1431_v23  ;;  %v1509_v2 = vmul.f32 %v2185_v26, %v1489_v63  ;;  %v1581_v63 = vpop.permute.xlu0 %1580 }
 0x80f   :  { %v1514_v30 = vmul.f32 %v1510_v22, %v1430_v28  ;;  %v1508_v35 = vmul.f32 %v2187_v1, %v1488_v24  ;;  %v1576_v22 = vpop.permute.xlu1 %1575 }
 0x810   :  { %v1519_v27 = vadd.f32 1.0, %v1515_v48  ;;  %v1513_v34 = vsub.f32 1.0, %v1509_v2 }
 0x811   :  { %v1518_v33 = vadd.f32 1.0, %v1514_v30  ;;  %v1512_v37 = vsub.f32 1.0, %v1508_v35 }
 0x812   :  { %v1523_v60 = vmul.f32 %v1519_v27, %v1419_v31  ;;  %v1517_v13 = vmul.f32 %v1513_v34, %v1433_v57  ;;  %v1591_v50 = vpop.permute.xlu0 %1590 }
 0x813   :  { %v1522_v36 = vmul.f32 %v1518_v33, %v1418_v46  ;;  %v1516_v0 = vmul.f32 %v1512_v37, %v1432_v41  ;;  %v1586_v28 = vpop.permute.xlu1 %1585 }
 0x814   :  { %v1527_v8 = vsel %vm363_vm10, %v1523_v60, 0.0  ;;  %v1521_v44 = vadd.f32 1.0, %v1517_v13 }
 0x815   :  { %v1526_v61 = vsel %vm363_vm10, %v1522_v36, 0.0  ;;  %v1520_v45 = vadd.f32 1.0, %v1516_v0 }
 0x816   :  { %v1528_v42 = vadd.f32 %v1527_v8, %v1526_v61  ;;  %v1525_v49 = vmul.f32 %v1521_v44, %v1421_v14  ;;  %v1609_v2 = vpop.permute.xlu0 %1608 }
 0x817   :  { %v1524_v12 = vmul.f32 %v1520_v45, %v1420_v43  ;;  %v1604_v30 = vpop.permute.xlu1 %1603 }
 0x818   :  { %v1531_v54 = vsel %vm363_vm10, %v1525_v49, 0.0 }
 0x819   :  { %v1529_v53 = vsel %vm363_vm10, %v1524_v12, 0.0 }
 0x81a   :  { %v1530_v25 = vadd.f32 %v1529_v53, %v1528_v42 }
 0x81b   :  { %v1614_v35 = vpop.permute.xlu1 %1613 }
 0x81c   :  { %v1532_v55 = vadd.f32 %v1531_v54, %v1530_v25 }
 0x81e   :  { %v1533_v18 = vrot.slane %v1532_v55, 4 }
 0x820   :  { %v1534_v11 = vadd.f32 %v1533_v18, %v1532_v55 }
 0x822   :  { %v1535_v51 = vrot.slane %v1534_v11, 2 }
 0x824   :  { %v1536_v7 = vadd.f32 %v1535_v51, %v1534_v11 }
 0x826   :  { %v1537_v56 = vrot.slane %v1536_v7, 1 }
 0x828   :  { %v1538_v4 = vadd.f32 %v1537_v56, %v1536_v7 }
 0x82a   :  { %v1540_v9 = vmul.f32 0.03125, %v1538_v4 }
 0x82c   :  { %v1541_v58 = vsub.f32 %v1522_v36, %v1540_v9  ;;  %v1542_v32 = vsub.f32 %v1523_v60, %v1540_v9  ;;  %v1543_v59 = vsub.f32 %v1524_v12, %v1540_v9  ;;  %v1544_v29 = vsub.f32 %v1525_v49, %v1540_v9  ;;  %v1619_v36 = vpop.permute.xlu0 %1618 }
 0x82e   :  { %v1545_v62 = vmul.f32 %v1541_v58, %v1541_v58  ;;  %v1546_v52 = vmul.f32 %v1542_v32, %v1542_v32  ;;  %v1547_v40 = vmul.f32 %v1543_v59, %v1543_v59  ;;  %v1548_v38 = vmul.f32 %v1544_v29, %v1544_v29 }
 0x830   :  { %v1549_v39 = vsel %vm363_vm10, %v1545_v62, 0.0  ;;  %v1550_v6 = vsel %vm363_vm10, %v1546_v52, 0.0  ;;  %v1552_v3 = vsel %vm363_vm10, %v1547_v40, 0.0  ;;  %v1554_v10 = vsel %vm363_vm10, %v1548_v38, 0.0 }
 0x831   :  { %v1551_v47 = vadd.f32 %v1550_v6, %v1549_v39 }
 0x833   :  { %v1553_v5 = vadd.f32 %v1552_v3, %v1551_v47 }
 0x835   :  { %v1555_v15 = vadd.f32 %v1554_v10, %v1553_v5 }
 0x837   :  { %v1556_v16 = vrot.slane %v1555_v15, 4 }
 0x839   :  { %v1557_v17 = vadd.f32 %v1556_v16, %v1555_v15 }
 0x83b   :  { %v1558_v19 = vrot.slane %v1557_v17, 2 }
 0x83d   :  { %v1559_v20 = vadd.f32 %v1558_v19, %v1557_v17 }
 0x83f   :  { %v1560_v21 = vrot.slane %v1559_v20, 1 }
 0x841   :  { %v1561_v23 = vadd.f32 %v1560_v21, %v1559_v20 }
 0x843   :  { %v1562_v26 = vmul.f32 0.03125, %v1561_v23 }
 0x845   :  { %v1563_v48 = vadd.f32 1e-05, %v1562_v26 }
 0x847   :  { %2188 = vrsqrt.f32 %v1563_v48 }
 0x851   :  { %v2189_v31 = vpop.eup %2188 }
 0x852   :  { %v1565_v27 = vmul.f32 %v2189_v31, %v1541_v58  ;;  %v1566_v24 = vmul.f32 %v2189_v31, %v1542_v32  ;;  %v1567_v1 = vmul.f32 %v2189_v31, %v1543_v59  ;;  %v1568_v46 = vmul.f32 %v2189_v31, %v1544_v29 }
 0x854   :  { %v1593_v33 = vmul.f32 %v1576_v22, %v1565_v27  ;;  %v1594_v34 = vmul.f32 %v1581_v63, %v1566_v24  ;;  %v1595_v60 = vmul.f32 %v1586_v28, %v1567_v1  ;;  %v1596_v57 = vmul.f32 %v1591_v50, %v1568_v46 }
 0x856   :  { %v1621_v13 = vadd.f32 %v1604_v30, %v1593_v33  ;;  %v1622_v8 = vadd.f32 %v1609_v2, %v1594_v34  ;;  %v1623_v37 = vadd.f32 %v1614_v35, %v1595_v60  ;;  %v1624_v61 = vadd.f32 %v1619_v36, %v1596_v57 }
 0x858   :  { %1625 = vst.msk [vmem:[%s2750_s12] sm:$0xff] %vm363_vm10, %v1621_v13  ;;  %1626 = vst.msk [vmem:[%s2750_s12 + $0x8] sm:$0xff] %vm363_vm10, %v1622_v8 }
 0x859   :  { %1627 = vst.msk [vmem:[%s2750_s12 + $0x10] sm:$0xff] %vm363_vm10, %v1623_v37  ;;  %1628 = vst.msk [vmem:[%s2750_s12 + $0x18] sm:$0xff] %vm363_vm10, %v1624_v61 }

</bundles_post_ra>
